<compile_context>
chip_gen: v7x
topology: tpu7x:2x2x1
jax: 0.10.0
libtpu: 0.0.40
codegen_flags: <defaults>
</compile_context>

<pallas_src>
import math
import jax
import jax.numpy as jnp
from jax.experimental import pallas as pl
from jax.experimental.pallas import tpu as pltpu

# ------------------------- tiny-BERT config -------------------------
VOCAB = 100
TYPE_VOCAB = 2
MAX_POS = 32
HIDDEN = 32
N_HEADS = 4
HEAD_DIM = HIDDEN // N_HEADS
INTER = 64
N_LAYERS = 2
OUT_DIM = 16
OUT_PAD = 128          # lane-dense output slab; sliced back to OUT_DIM in the wrapper
LN_EPS = 1e-12

# weights that live inside the fused kernel (stacked over the encoder axis)
KERNEL_WEIGHT_KEYS = ('w_qkvo', 'b_qkvo', 'w_ff1', 'b_ff1', 'w_ff2', 'b_ff2',
                      'ln_g', 'ln_b', 'w_pool', 'b_pool', 'w_add', 'b_add')


def _layernorm(x, g, b, eps=LN_EPS):
    mu = jnp.mean(x, axis=-1, keepdims=True)
    var = jnp.mean(jnp.square(x - mu), axis=-1, keepdims=True)
    return (x - mu) * jax.lax.rsqrt(var + eps) * g + b


def _enc_spec(arr):
    # Block only the leading encoder axis; the minor dims always equal the full array,
    # so the (8,128) block-divisibility rule is satisfied for every input.
    n = arr.ndim
    return pl.BlockSpec((1,) + tuple(arr.shape[1:]),
                        lambda e, n=n: (e,) + (0,) * (n - 1))


# ------------------------- the single fused kernel -------------------------
def fused_encoder_call(w, emb, amask, B, S):
    """Run E independent BERT encoders (one per grid step) fully fused.

    emb   : (E, B*S, H)  summed token+pos+type embeddings (pre-LayerNorm)
    amask : (E, B*S, B*S) additive attention mask (batch block-diag + key padding)
    w     : dict of weights stacked over the leading encoder axis E
    returns (E, B, OUT_DIM)
    """
    E, BS, H = emb.shape
    assert BS == B * S and H == HIDDEN

    def kernel(emb_ref, amask_ref,
               wqkvo_ref, bqkvo_ref, wff1_ref, bff1_ref, wff2_ref, bff2_ref,
               lng_ref, lnb_ref, wpool_ref, bpool_ref, wadd_ref, badd_ref,
               o_ref):
        x = emb_ref[0]            # (B*S, H)
        amask_v = amask_ref[0]    # (B*S, B*S)

        # Per-head lane masks, hoisted once (outside the layer loop): full-width masked
        # matmuls replace HEAD_DIM-wide lane slices of q/k/v/wo.
        lane = jax.lax.broadcasted_iota(jnp.int32, (1, HIDDEN), 1)
        head_masks = [
            jnp.where((lane >= h * HEAD_DIM) & (lane < (h + 1) * HEAD_DIM), 1.0, 0.0)
            for h in range(N_HEADS)]

        # Embedding LayerNorm (fused; no standalone pallas_call).
        x = _layernorm(x, lng_ref[0, 0:1, :], lnb_ref[0, 0:1, :])

        scale = 1.0 / math.sqrt(HEAD_DIM)
        for l in range(N_LAYERS):                       # static, fully unrolled
            wq = wqkvo_ref[0, 4 * l + 0, :, :]
            wk = wqkvo_ref[0, 4 * l + 1, :, :]
            wv = wqkvo_ref[0, 4 * l + 2, :, :]
            wo = wqkvo_ref[0, 4 * l + 3, :, :]
            bq = bqkvo_ref[0, 4 * l + 0:4 * l + 1, :]
            bk = bqkvo_ref[0, 4 * l + 1:4 * l + 2, :]
            bv = bqkvo_ref[0, 4 * l + 2:4 * l + 3, :]
            bo = bqkvo_ref[0, 4 * l + 3:4 * l + 4, :]

            q = jnp.dot(x, wq, preferred_element_type=jnp.float32) + bq
            k = jnp.dot(x, wk, preferred_element_type=jnp.float32) + bk
            v = jnp.dot(x, wv, preferred_element_type=jnp.float32) + bv
            q = q * scale                               # fold 1/sqrt(d) once, not per head

            # Multi-head attention without lane slicing:
            #   q @ (k*mask_h)^T == q_h @ k_h^T   (zeros contribute nothing)
            #   (p_h @ v) * mask_h                == head-h slot of concat(ctx_h)
            ctx = jnp.zeros_like(x)
            for hm in head_masks:
                s = jax.lax.dot_general(q, k * hm, (((1,), (1,)), ((), ())),
                                        preferred_element_type=jnp.float32)
                s = s + amask_v
                s = s - jnp.max(s, axis=-1, keepdims=True)
                p = jnp.exp(s)
                p = p * pl.reciprocal(jnp.sum(p, axis=-1, keepdims=True), approx=True)
                ctx = ctx + jnp.dot(p, v, preferred_element_type=jnp.float32) * hm

            attn_out = jnp.dot(ctx, wo, preferred_element_type=jnp.float32) + bo
            x = _layernorm(x + attn_out,
                           lng_ref[0, 1 + 2 * l:2 + 2 * l, :],
                           lnb_ref[0, 1 + 2 * l:2 + 2 * l, :])

            h1 = (jnp.dot(x, wff1_ref[0, l, :, :], preferred_element_type=jnp.float32)
                  + bff1_ref[0, l:l + 1, :])
            h1 = jax.nn.gelu(h1, approximate=True)      # tanh-approx GELU (EUP)
            ffn = (jnp.dot(h1, wff2_ref[0, l, :, :], preferred_element_type=jnp.float32)
                   + bff2_ref[0, l:l + 1, :])
            x = _layernorm(x + ffn,
                           lng_ref[0, 2 + 2 * l:3 + 2 * l, :],
                           lnb_ref[0, 2 + 2 * l:3 + 2 * l, :])

        # CLS-row extraction as a tiny selection matmul (rows b*S) -> no strided slicing.
        r = jax.lax.broadcasted_iota(jnp.int32, (B, BS), 0)
        c = jax.lax.broadcasted_iota(jnp.int32, (B, BS), 1)
        sel = jnp.where(c == r * S, 1.0, 0.0)
        cls = jnp.dot(sel, x, preferred_element_type=jnp.float32)          # (B, H)

        pooled = jnp.tanh(jnp.dot(cls, wpool_ref[0],
                                  preferred_element_type=jnp.float32) + bpool_ref[0])
        # Lane-dense (B, 128) output slab (unmasked stores); wrapper slices to OUT_DIM.
        o_ref[0] = (jnp.dot(pooled, wadd_ref[0],
                            preferred_element_type=jnp.float32) + badd_ref[0])

    inputs = (emb, amask,
              w['w_qkvo'], w['b_qkvo'], w['w_ff1'], w['b_ff1'],
              w['w_ff2'], w['b_ff2'], w['ln_g'], w['ln_b'],
              w['w_pool'], w['b_pool'], w['w_add'], w['b_add'])

    out = pl.pallas_call(
        kernel,
        out_shape=jax.ShapeDtypeStruct((E, B, OUT_PAD), jnp.float32),
        grid=(E,),
        in_specs=[_enc_spec(a) for a in inputs],
        out_specs=pl.BlockSpec((1, B, OUT_PAD), lambda e: (e, 0, 0)),
        compiler_params=pltpu.CompilerParams(
            # one encoder per grid step: on v7x the two encoders split across the two
            # TensorCores; on v5e/v6e this is two sequential steps in ONE custom call.
            dimension_semantics=("parallel",)),
    )(*inputs)
    return out[:, :, :OUT_DIM]


# ------------------------- parameters (deterministic, synthetic) -------------------------
def _dense(key, shape, scale=0.02):
    return (scale * jax.random.normal(key, shape)).astype(jnp.float32)


def init_bert_encoder_params(key):
    ks = jax.random.split(key, 8)
    p = {
        'word_emb': _dense(ks[0], (VOCAB, HIDDEN)),
        'pos_emb': _dense(ks[1], (MAX_POS, HIDDEN)),
        'type_emb': _dense(ks[2], (TYPE_VOCAB, HIDDEN)),
        # packed transformer weights: [q,k,v,o] per layer, biases packed alongside
        'w_qkvo': _dense(ks[3], (N_LAYERS * 4, HIDDEN, HIDDEN)),
        'b_qkvo': jnp.zeros((N_LAYERS * 4, HIDDEN), jnp.float32),
        'w_ff1': _dense(ks[4], (N_LAYERS, HIDDEN, INTER)),
        'b_ff1': jnp.zeros((N_LAYERS, INTER), jnp.float32),
        'w_ff2': _dense(ks[5], (N_LAYERS, INTER, HIDDEN)),
        'b_ff2': jnp.zeros((N_LAYERS, HIDDEN), jnp.float32),
        # LayerNorms packed as [emb_ln, (attn_ln, ffn_ln) x L]
        'ln_g': jnp.ones((1 + 2 * N_LAYERS, HIDDEN), jnp.float32),
        'ln_b': jnp.zeros((1 + 2 * N_LAYERS, HIDDEN), jnp.float32),
        'w_pool': _dense(ks[6], (HIDDEN, HIDDEN)),
        'b_pool': jnp.zeros((1, HIDDEN), jnp.float32),
        # additional_linear (add_linear=True), zero-padded to a lane-dense 128-wide slab
        'w_add': jnp.pad(_dense(ks[7], (HIDDEN, OUT_DIM)),
                         ((0, 0), (0, OUT_PAD - OUT_DIM))),
        'b_add': jnp.zeros((1, OUT_PAD), jnp.float32),
    }
    return p


# ------------------------- plain-JAX glue (embedding gather + mask build) -------------------------
def _embed(params, token_ids, segment_ids):
    # TODO(synk): token/pos/type table gather stays in plain JAX (data-dependent HBM
    # gather has no cheap rectangular-BlockSpec equivalent at these shapes).
    B, S = token_ids.shape
    emb = (params['word_emb'][token_ids]
           + params['pos_emb'][jnp.arange(S)][None, :, :]
           + params['type_emb'][segment_ids])
    return emb.astype(jnp.float32).reshape(B * S, HIDDEN)


def _build_attn_mask(attention_mask):
    # (B*S, B*S) additive mask: 0 keep, -10000 for padded keys AND cross-batch keys.
    # Cross-batch/padded entries underflow to exactly 0 after softmax, so this is
    # numerically identical to per-batch attention with the standard -10000 key mask.
    B, S = attention_mask.shape
    bidx = jnp.arange(B * S) // S
    same_batch = bidx[:, None] == bidx[None, :]
    key_keep = attention_mask.reshape(B * S) > 0
    keep = same_batch & key_keep[None, :]
    return jnp.where(keep, 0.0, -10000.0).astype(jnp.float32)


def _encode_group(entries):
    """entries: list of (params, token_ids, segment_ids, attention_mask) with identical
    token shapes -> all encoders run in ONE fused pallas_call."""
    B, S = entries[0][1].shape
    emb = jnp.stack([_embed(p, t, sg) for (p, t, sg, m) in entries], 0)
    amask = jnp.stack([_build_attn_mask(m) for (p, t, sg, m) in entries], 0)
    stacked_w = jax.tree_util.tree_map(
        lambda *xs: jnp.stack(xs, 0),
        *[{k: p[k] for k in KERNEL_WEIGHT_KEYS} for (p, t, sg, m) in entries])
    return fused_encoder_call(stacked_w, emb, amask, B, S)      # (E, B, OUT_DIM)


def biencoder_forward(ctxt_params, cand_params,
                      token_idx_ctxt, segment_idx_ctxt, mask_ctxt,
                      token_idx_cands, segment_idx_cands, mask_cands):
    entries = []
    if token_idx_ctxt is not None:
        entries.append((ctxt_params, token_idx_ctxt, segment_idx_ctxt, mask_ctxt))
    if token_idx_cands is not None:
        entries.append((cand_params, token_idx_cands, segment_idx_cands, mask_cands))
    if not entries:
        return None, None

    if len({e[1].shape for e in entries}) == 1:
        out = _encode_group(entries)                         # one fused call for all encoders
        outs = [out[i] for i in range(out.shape[0])]
    else:
        outs = [_encode_group([e])[0] for e in entries]      # fallback: shapes differ

    it = iter(outs)
    embedding_ctxt = next(it) if token_idx_ctxt is not None else None
    embedding_cands = next(it) if token_idx_cands is not None else None
    return embedding_ctxt, embedding_cands


# ------------------------- main -------------------------
if __name__ == "__main__":
    key = jax.random.PRNGKey(0)
    k_ctxt, k_cand, k_tok1, k_tok2 = jax.random.split(key, 4)

    ctxt_params = init_bert_encoder_params(k_ctxt)
    cand_params = init_bert_encoder_params(k_cand)

    B, S = 2, 8
    token_idx_ctxt = jax.random.randint(k_tok1, (B, S), 0, VOCAB, dtype=jnp.int32)
    token_idx_cands = jax.random.randint(k_tok2, (B, S), 0, VOCAB, dtype=jnp.int32)
    segment_idx_ctxt = jnp.zeros((B, S), jnp.int32)
    segment_idx_cands = jnp.zeros((B, S), jnp.int32)
    mask_ctxt = jnp.ones((B, S), jnp.int32).at[1, -2:].set(0)
    mask_cands = jnp.ones((B, S), jnp.int32).at[0, -1:].set(0)

    fwd = jax.jit(biencoder_forward)
    emb_ctxt, emb_cands = fwd(ctxt_params, cand_params,
                              token_idx_ctxt, segment_idx_ctxt, mask_ctxt,
                              token_idx_cands, segment_idx_cands, mask_cands)

    jax.block_until_ready((emb_ctxt, emb_cands))
    assert emb_ctxt.shape == (B, OUT_DIM) and emb_cands.shape == (B, OUT_DIM)
    assert bool(jnp.all(jnp.isfinite(emb_ctxt))) and bool(jnp.all(jnp.isfinite(emb_cands)))
    print("KERNEL_OK")
</pallas_src>

<mosaic_0001>
module attributes {stable_mosaic.version = 11 : i64} {
  func.func @kernel(%arg0: i32, %arg1: memref<1x16x32xf32, #tpu.memory_space<vmem>>, %arg2: memref<1x16x16xf32, #tpu.memory_space<vmem>>, %arg3: memref<1x8x32x32xf32, #tpu.memory_space<vmem>>, %arg4: memref<1x8x32xf32, #tpu.memory_space<vmem>>, %arg5: memref<1x2x32x64xf32, #tpu.memory_space<vmem>>, %arg6: memref<1x2x64xf32, #tpu.memory_space<vmem>>, %arg7: memref<1x2x64x32xf32, #tpu.memory_space<vmem>>, %arg8: memref<1x2x32xf32, #tpu.memory_space<vmem>>, %arg9: memref<1x5x32xf32, #tpu.memory_space<vmem>>, %arg10: memref<1x5x32xf32, #tpu.memory_space<vmem>>, %arg11: memref<1x32x32xf32, #tpu.memory_space<vmem>>, %arg12: memref<1x1x32xf32, #tpu.memory_space<vmem>>, %arg13: memref<1x32x128xf32, #tpu.memory_space<vmem>>, %arg14: memref<1x1x128xf32, #tpu.memory_space<vmem>>, %arg15: memref<1x2x128xf32, #tpu.memory_space<vmem>>) attributes {dimension_semantics = [#tpu.dimension_semantics<parallel>], iteration_bounds = array<i64: 2>, scalar_prefetch = 0 : i64, scratch_operands = 0 : i64, tpu.core_type = #tpu.core_type<tc>, window_params = [{transform_indices = @transform_0, window_bounds = array<i64: 1, 16, 32>}, {transform_indices = @transform_1, window_bounds = array<i64: 1, 16, 16>}, {transform_indices = @transform_2, window_bounds = array<i64: 1, 8, 32, 32>}, {transform_indices = @transform_3, window_bounds = array<i64: 1, 8, 32>}, {transform_indices = @transform_4, window_bounds = array<i64: 1, 2, 32, 64>}, {transform_indices = @transform_5, window_bounds = array<i64: 1, 2, 64>}, {transform_indices = @transform_6, window_bounds = array<i64: 1, 2, 64, 32>}, {transform_indices = @transform_7, window_bounds = array<i64: 1, 2, 32>}, {transform_indices = @transform_8, window_bounds = array<i64: 1, 5, 32>}, {transform_indices = @transform_9, window_bounds = array<i64: 1, 5, 32>}, {transform_indices = @transform_10, window_bounds = array<i64: 1, 32, 32>}, {transform_indices = @transform_11, window_bounds = array<i64: 1, 1, 32>}, {transform_indices = @transform_12, window_bounds = array<i64: 1, 32, 128>}, {transform_indices = @transform_13, window_bounds = array<i64: 1, 1, 128>}, {transform_indices = @transform_14, window_bounds = array<i64: 1, 2, 128>}]} {
    %c0 = arith.constant 0 : index
    %c0_0 = arith.constant 0 : index
    %c0_1 = arith.constant 0 : index
    %0 = vector.load %arg1[%c0, %c0_0, %c0_1] : memref<1x16x32xf32, #tpu.memory_space<vmem>>, vector<1x16x32xf32>
    %1 = vector.shape_cast %0 : vector<1x16x32xf32> to vector<16x32xf32>
    %c0_2 = arith.constant 0 : index
    %c0_3 = arith.constant 0 : index
    %c0_4 = arith.constant 0 : index
    %2 = vector.load %arg2[%c0_2, %c0_3, %c0_4] : memref<1x16x16xf32, #tpu.memory_space<vmem>>, vector<1x16x16xf32>
    %3 = vector.shape_cast %2 : vector<1x16x16xf32> to vector<16x16xf32>
    %4 = tpu.iota {dimensions = array<i32: 1>} : vector<1x32xi32>
    %c0_i32 = arith.constant 0 : i32
    %5 = vector.broadcast %c0_i32 : i32 to vector<1x32xi32>
    %6 = arith.cmpi sge, %4, %5 : vector<1x32xi32>
    %c8_i32 = arith.constant 8 : i32
    %7 = vector.broadcast %c8_i32 : i32 to vector<1x32xi32>
    %8 = arith.cmpi slt, %4, %7 : vector<1x32xi32>
    %9 = arith.andi %6, %8 : vector<1x32xi1>
    %cst = arith.constant 1.000000e+00 : f32
    %cst_5 = arith.constant 0.000000e+00 : f32
    %10 = vector.broadcast %cst : f32 to vector<1x32xf32>
    %11 = vector.broadcast %cst_5 : f32 to vector<1x32xf32>
    %12 = arith.select %9, %10, %11 : vector<1x32xi1>, vector<1x32xf32>
    %c8_i32_6 = arith.constant 8 : i32
    %13 = vector.broadcast %c8_i32_6 : i32 to vector<1x32xi32>
    %14 = arith.cmpi sge, %4, %13 : vector<1x32xi32>
    %c16_i32 = arith.constant 16 : i32
    %15 = vector.broadcast %c16_i32 : i32 to vector<1x32xi32>
    %16 = arith.cmpi slt, %4, %15 : vector<1x32xi32>
    %17 = arith.andi %14, %16 : vector<1x32xi1>
    %cst_7 = arith.constant 1.000000e+00 : f32
    %cst_8 = arith.constant 0.000000e+00 : f32
    %18 = vector.broadcast %cst_7 : f32 to vector<1x32xf32>
    %19 = vector.broadcast %cst_8 : f32 to vector<1x32xf32>
    %20 = arith.select %17, %18, %19 : vector<1x32xi1>, vector<1x32xf32>
    %c16_i32_9 = arith.constant 16 : i32
    %21 = vector.broadcast %c16_i32_9 : i32 to vector<1x32xi32>
    %22 = arith.cmpi sge, %4, %21 : vector<1x32xi32>
    %c24_i32 = arith.constant 24 : i32
    %23 = vector.broadcast %c24_i32 : i32 to vector<1x32xi32>
    %24 = arith.cmpi slt, %4, %23 : vector<1x32xi32>
    %25 = arith.andi %22, %24 : vector<1x32xi1>
    %cst_10 = arith.constant 1.000000e+00 : f32
    %cst_11 = arith.constant 0.000000e+00 : f32
    %26 = vector.broadcast %cst_10 : f32 to vector<1x32xf32>
    %27 = vector.broadcast %cst_11 : f32 to vector<1x32xf32>
    %28 = arith.select %25, %26, %27 : vector<1x32xi1>, vector<1x32xf32>
    %c24_i32_12 = arith.constant 24 : i32
    %29 = vector.broadcast %c24_i32_12 : i32 to vector<1x32xi32>
    %30 = arith.cmpi sge, %4, %29 : vector<1x32xi32>
    %c32_i32 = arith.constant 32 : i32
    %31 = vector.broadcast %c32_i32 : i32 to vector<1x32xi32>
    %32 = arith.cmpi slt, %4, %31 : vector<1x32xi32>
    %33 = arith.andi %30, %32 : vector<1x32xi1>
    %cst_13 = arith.constant 1.000000e+00 : f32
    %cst_14 = arith.constant 0.000000e+00 : f32
    %34 = vector.broadcast %cst_13 : f32 to vector<1x32xf32>
    %35 = vector.broadcast %cst_14 : f32 to vector<1x32xf32>
    %36 = arith.select %33, %34, %35 : vector<1x32xi1>, vector<1x32xf32>
    %c0_15 = arith.constant 0 : index
    %c0_16 = arith.constant 0 : index
    %c0_17 = arith.constant 0 : index
    %37 = vector.load %arg9[%c0_15, %c0_16, %c0_17] : memref<1x5x32xf32, #tpu.memory_space<vmem>>, vector<1x1x32xf32>
    %38 = vector.shape_cast %37 : vector<1x1x32xf32> to vector<1x32xf32>
    %c0_18 = arith.constant 0 : index
    %c0_19 = arith.constant 0 : index
    %c0_20 = arith.constant 0 : index
    %39 = vector.load %arg10[%c0_18, %c0_19, %c0_20] : memref<1x5x32xf32, #tpu.memory_space<vmem>>, vector<1x1x32xf32>
    %40 = vector.shape_cast %39 : vector<1x1x32xf32> to vector<1x32xf32>
    %cst_21 = arith.constant dense<0.000000e+00> : vector<16xf32>
    %41 = vector.multi_reduction <add>, %1, %cst_21 [1] : vector<16x32xf32> to vector<16xf32>
    %42 = vector.shape_cast %41 : vector<16xf32> to vector<16x1xf32>
    %cst_22 = arith.constant 3.200000e+01 : f32
    %43 = vector.broadcast %cst_22 : f32 to vector<16x1xf32>
    %44 = arith.divf %42, %43 : vector<16x1xf32>
    %45 = vector.broadcast %44 : vector<16x1xf32> to vector<16x32xf32>
    %46 = arith.subf %1, %45 : vector<16x32xf32>
    %47 = arith.mulf %46, %46 : vector<16x32xf32>
    %cst_23 = arith.constant dense<0.000000e+00> : vector<16xf32>
    %48 = vector.multi_reduction <add>, %47, %cst_23 [1] : vector<16x32xf32> to vector<16xf32>
    %49 = vector.shape_cast %48 : vector<16xf32> to vector<16x1xf32>
    %cst_24 = arith.constant 3.200000e+01 : f32
    %50 = vector.broadcast %cst_24 : f32 to vector<16x1xf32>
    %51 = arith.divf %49, %50 : vector<16x1xf32>
    %52 = vector.broadcast %44 : vector<16x1xf32> to vector<16x32xf32>
    %53 = arith.subf %1, %52 : vector<16x32xf32>
    %cst_25 = arith.constant 9.99999996E-13 : f32
    %54 = vector.broadcast %cst_25 : f32 to vector<16x1xf32>
    %55 = arith.addf %51, %54 : vector<16x1xf32>
    %56 = math.rsqrt %55 : vector<16x1xf32>
    %57 = vector.broadcast %56 : vector<16x1xf32> to vector<16x32xf32>
    %58 = arith.mulf %53, %57 : vector<16x32xf32>
    %59 = vector.broadcast %38 : vector<1x32xf32> to vector<16x32xf32>
    %60 = arith.mulf %58, %59 : vector<16x32xf32>
    %61 = vector.broadcast %40 : vector<1x32xf32> to vector<16x32xf32>
    %62 = arith.addf %60, %61 : vector<16x32xf32>
    %c0_26 = arith.constant 0 : index
    %c0_27 = arith.constant 0 : index
    %c0_28 = arith.constant 0 : index
    %c0_29 = arith.constant 0 : index
    %63 = vector.load %arg3[%c0_26, %c0_27, %c0_28, %c0_29] : memref<1x8x32x32xf32, #tpu.memory_space<vmem>>, vector<1x1x32x32xf32>
    %64 = vector.shape_cast %63 : vector<1x1x32x32xf32> to vector<32x32xf32>
    %c0_30 = arith.constant 0 : index
    %c1 = arith.constant 1 : index
    %c0_31 = arith.constant 0 : index
    %c0_32 = arith.constant 0 : index
    %65 = vector.load %arg3[%c0_30, %c1, %c0_31, %c0_32] : memref<1x8x32x32xf32, #tpu.memory_space<vmem>>, vector<1x1x32x32xf32>
    %66 = vector.shape_cast %65 : vector<1x1x32x32xf32> to vector<32x32xf32>
    %c0_33 = arith.constant 0 : index
    %c2 = arith.constant 2 : index
    %c0_34 = arith.constant 0 : index
    %c0_35 = arith.constant 0 : index
    %67 = vector.load %arg3[%c0_33, %c2, %c0_34, %c0_35] : memref<1x8x32x32xf32, #tpu.memory_space<vmem>>, vector<1x1x32x32xf32>
    %68 = vector.shape_cast %67 : vector<1x1x32x32xf32> to vector<32x32xf32>
    %c0_36 = arith.constant 0 : index
    %c3 = arith.constant 3 : index
    %c0_37 = arith.constant 0 : index
    %c0_38 = arith.constant 0 : index
    %69 = vector.load %arg3[%c0_36, %c3, %c0_37, %c0_38] : memref<1x8x32x32xf32, #tpu.memory_space<vmem>>, vector<1x1x32x32xf32>
    %70 = vector.shape_cast %69 : vector<1x1x32x32xf32> to vector<32x32xf32>
    %c0_39 = arith.constant 0 : index
    %c0_40 = arith.constant 0 : index
    %c0_41 = arith.constant 0 : index
    %71 = vector.load %arg4[%c0_39, %c0_40, %c0_41] : memref<1x8x32xf32, #tpu.memory_space<vmem>>, vector<1x1x32xf32>
    %72 = vector.shape_cast %71 : vector<1x1x32xf32> to vector<1x32xf32>
    %c0_42 = arith.constant 0 : index
    %c1_43 = arith.constant 1 : index
    %c0_44 = arith.constant 0 : index
    %73 = vector.load %arg4[%c0_42, %c1_43, %c0_44] : memref<1x8x32xf32, #tpu.memory_space<vmem>>, vector<1x1x32xf32>
    %74 = vector.shape_cast %73 : vector<1x1x32xf32> to vector<1x32xf32>
    %c0_45 = arith.constant 0 : index
    %c2_46 = arith.constant 2 : index
    %c0_47 = arith.constant 0 : index
    %75 = vector.load %arg4[%c0_45, %c2_46, %c0_47] : memref<1x8x32xf32, #tpu.memory_space<vmem>>, vector<1x1x32xf32>
    %76 = vector.shape_cast %75 : vector<1x1x32xf32> to vector<1x32xf32>
    %c0_48 = arith.constant 0 : index
    %c3_49 = arith.constant 3 : index
    %c0_50 = arith.constant 0 : index
    %77 = vector.load %arg4[%c0_48, %c3_49, %c0_50] : memref<1x8x32xf32, #tpu.memory_space<vmem>>, vector<1x1x32xf32>
    %78 = vector.shape_cast %77 : vector<1x1x32xf32> to vector<1x32xf32>
    %cst_51 = arith.constant dense<0.000000e+00> : vector<16x32xf32>
    %79 = tpu.matmul %62, %64, %cst_51 {dimension_numbers = #tpu.dot_dimension_numbers<[1], [0], [0], [1], [0, 0, 1, 1], [], []>} : vector<16x32xf32>, vector<32x32xf32>, vector<16x32xf32> -> vector<16x32xf32>
    %80 = vector.broadcast %72 : vector<1x32xf32> to vector<16x32xf32>
    %81 = arith.addf %79, %80 : vector<16x32xf32>
    %cst_52 = arith.constant dense<0.000000e+00> : vector<16x32xf32>
    %82 = tpu.matmul %62, %66, %cst_52 {dimension_numbers = #tpu.dot_dimension_numbers<[1], [0], [0], [1], [0, 0, 1, 1], [], []>} : vector<16x32xf32>, vector<32x32xf32>, vector<16x32xf32> -> vector<16x32xf32>
    %83 = vector.broadcast %74 : vector<1x32xf32> to vector<16x32xf32>
    %84 = arith.addf %82, %83 : vector<16x32xf32>
    %cst_53 = arith.constant dense<0.000000e+00> : vector<16x32xf32>
    %85 = tpu.matmul %62, %68, %cst_53 {dimension_numbers = #tpu.dot_dimension_numbers<[1], [0], [0], [1], [0, 0, 1, 1], [], []>} : vector<16x32xf32>, vector<32x32xf32>, vector<16x32xf32> -> vector<16x32xf32>
    %86 = vector.broadcast %76 : vector<1x32xf32> to vector<16x32xf32>
    %87 = arith.addf %85, %86 : vector<16x32xf32>
    %cst_54 = arith.constant 0.353553385 : f32
    %88 = vector.broadcast %cst_54 : f32 to vector<16x32xf32>
    %89 = arith.mulf %81, %88 : vector<16x32xf32>
    %cst_55 = arith.constant 0.000000e+00 : f32
    %90 = vector.broadcast %cst_55 : f32 to vector<16x32xf32>
    %91 = vector.broadcast %12 : vector<1x32xf32> to vector<16x32xf32>
    %92 = arith.mulf %84, %91 : vector<16x32xf32>
    %cst_56 = arith.constant dense<0.000000e+00> : vector<16x16xf32>
    %93 = tpu.matmul %89, %92, %cst_56 {dimension_numbers = #tpu.dot_dimension_numbers<[1], [1], [0], [0], [0, 0, 1, 0], [], []>} : vector<16x32xf32>, vector<16x32xf32>, vector<16x16xf32> -> vector<16x16xf32>
    %94 = arith.addf %93, %3 : vector<16x16xf32>
    %cst_57 = arith.constant dense<0xFF800000> : vector<16xf32>
    %95 = vector.multi_reduction <maximumf>, %94, %cst_57 [1] : vector<16x16xf32> to vector<16xf32>
    %96 = vector.shape_cast %95 : vector<16xf32> to vector<16x1xf32>
    %97 = vector.broadcast %96 : vector<16x1xf32> to vector<16x16xf32>
    %98 = arith.subf %94, %97 : vector<16x16xf32>
    %99 = math.exp %98 : vector<16x16xf32>
    %cst_58 = arith.constant dense<0.000000e+00> : vector<16xf32>
    %100 = vector.multi_reduction <add>, %99, %cst_58 [1] : vector<16x16xf32> to vector<16xf32>
    %101 = vector.shape_cast %100 : vector<16xf32> to vector<16x1xf32>
    %102 = tpu.reciprocal %101 {approx = true} : vector<16x1xf32> -> vector<16x1xf32>
    %103 = vector.broadcast %102 : vector<16x1xf32> to vector<16x16xf32>
    %104 = arith.mulf %99, %103 : vector<16x16xf32>
    %cst_59 = arith.constant dense<0.000000e+00> : vector<16x32xf32>
    %105 = tpu.matmul %104, %87, %cst_59 {dimension_numbers = #tpu.dot_dimension_numbers<[1], [0], [0], [1], [0, 0, 1, 1], [], []>} : vector<16x16xf32>, vector<16x32xf32>, vector<16x32xf32> -> vector<16x32xf32>
    %106 = vector.broadcast %12 : vector<1x32xf32> to vector<16x32xf32>
    %107 = arith.mulf %105, %106 : vector<16x32xf32>
    %108 = arith.addf %90, %107 : vector<16x32xf32>
    %109 = vector.broadcast %20 : vector<1x32xf32> to vector<16x32xf32>
    %110 = arith.mulf %84, %109 : vector<16x32xf32>
    %cst_60 = arith.constant dense<0.000000e+00> : vector<16x16xf32>
    %111 = tpu.matmul %89, %110, %cst_60 {dimension_numbers = #tpu.dot_dimension_numbers<[1], [1], [0], [0], [0, 0, 1, 0], [], []>} : vector<16x32xf32>, vector<16x32xf32>, vector<16x16xf32> -> vector<16x16xf32>
    %112 = arith.addf %111, %3 : vector<16x16xf32>
    %cst_61 = arith.constant dense<0xFF800000> : vector<16xf32>
    %113 = vector.multi_reduction <maximumf>, %112, %cst_61 [1] : vector<16x16xf32> to vector<16xf32>
    %114 = vector.shape_cast %113 : vector<16xf32> to vector<16x1xf32>
    %115 = vector.broadcast %114 : vector<16x1xf32> to vector<16x16xf32>
    %116 = arith.subf %112, %115 : vector<16x16xf32>
    %117 = math.exp %116 : vector<16x16xf32>
    %cst_62 = arith.constant dense<0.000000e+00> : vector<16xf32>
    %118 = vector.multi_reduction <add>, %117, %cst_62 [1] : vector<16x16xf32> to vector<16xf32>
    %119 = vector.shape_cast %118 : vector<16xf32> to vector<16x1xf32>
    %120 = tpu.reciprocal %119 {approx = true} : vector<16x1xf32> -> vector<16x1xf32>
    %121 = vector.broadcast %120 : vector<16x1xf32> to vector<16x16xf32>
    %122 = arith.mulf %117, %121 : vector<16x16xf32>
    %cst_63 = arith.constant dense<0.000000e+00> : vector<16x32xf32>
    %123 = tpu.matmul %122, %87, %cst_63 {dimension_numbers = #tpu.dot_dimension_numbers<[1], [0], [0], [1], [0, 0, 1, 1], [], []>} : vector<16x16xf32>, vector<16x32xf32>, vector<16x32xf32> -> vector<16x32xf32>
    %124 = vector.broadcast %20 : vector<1x32xf32> to vector<16x32xf32>
    %125 = arith.mulf %123, %124 : vector<16x32xf32>
    %126 = arith.addf %108, %125 : vector<16x32xf32>
    %127 = vector.broadcast %28 : vector<1x32xf32> to vector<16x32xf32>
    %128 = arith.mulf %84, %127 : vector<16x32xf32>
    %cst_64 = arith.constant dense<0.000000e+00> : vector<16x16xf32>
    %129 = tpu.matmul %89, %128, %cst_64 {dimension_numbers = #tpu.dot_dimension_numbers<[1], [1], [0], [0], [0, 0, 1, 0], [], []>} : vector<16x32xf32>, vector<16x32xf32>, vector<16x16xf32> -> vector<16x16xf32>
    %130 = arith.addf %129, %3 : vector<16x16xf32>
    %cst_65 = arith.constant dense<0xFF800000> : vector<16xf32>
    %131 = vector.multi_reduction <maximumf>, %130, %cst_65 [1] : vector<16x16xf32> to vector<16xf32>
    %132 = vector.shape_cast %131 : vector<16xf32> to vector<16x1xf32>
    %133 = vector.broadcast %132 : vector<16x1xf32> to vector<16x16xf32>
    %134 = arith.subf %130, %133 : vector<16x16xf32>
    %135 = math.exp %134 : vector<16x16xf32>
    %cst_66 = arith.constant dense<0.000000e+00> : vector<16xf32>
    %136 = vector.multi_reduction <add>, %135, %cst_66 [1] : vector<16x16xf32> to vector<16xf32>
    %137 = vector.shape_cast %136 : vector<16xf32> to vector<16x1xf32>
    %138 = tpu.reciprocal %137 {approx = true} : vector<16x1xf32> -> vector<16x1xf32>
    %139 = vector.broadcast %138 : vector<16x1xf32> to vector<16x16xf32>
    %140 = arith.mulf %135, %139 : vector<16x16xf32>
    %cst_67 = arith.constant dense<0.000000e+00> : vector<16x32xf32>
    %141 = tpu.matmul %140, %87, %cst_67 {dimension_numbers = #tpu.dot_dimension_numbers<[1], [0], [0], [1], [0, 0, 1, 1], [], []>} : vector<16x16xf32>, vector<16x32xf32>, vector<16x32xf32> -> vector<16x32xf32>
    %142 = vector.broadcast %28 : vector<1x32xf32> to vector<16x32xf32>
    %143 = arith.mulf %141, %142 : vector<16x32xf32>
    %144 = arith.addf %126, %143 : vector<16x32xf32>
    %145 = vector.broadcast %36 : vector<1x32xf32> to vector<16x32xf32>
    %146 = arith.mulf %84, %145 : vector<16x32xf32>
    %cst_68 = arith.constant dense<0.000000e+00> : vector<16x16xf32>
    %147 = tpu.matmul %89, %146, %cst_68 {dimension_numbers = #tpu.dot_dimension_numbers<[1], [1], [0], [0], [0, 0, 1, 0], [], []>} : vector<16x32xf32>, vector<16x32xf32>, vector<16x16xf32> -> vector<16x16xf32>
    %148 = arith.addf %147, %3 : vector<16x16xf32>
    %cst_69 = arith.constant dense<0xFF800000> : vector<16xf32>
    %149 = vector.multi_reduction <maximumf>, %148, %cst_69 [1] : vector<16x16xf32> to vector<16xf32>
    %150 = vector.shape_cast %149 : vector<16xf32> to vector<16x1xf32>
    %151 = vector.broadcast %150 : vector<16x1xf32> to vector<16x16xf32>
    %152 = arith.subf %148, %151 : vector<16x16xf32>
    %153 = math.exp %152 : vector<16x16xf32>
    %cst_70 = arith.constant dense<0.000000e+00> : vector<16xf32>
    %154 = vector.multi_reduction <add>, %153, %cst_70 [1] : vector<16x16xf32> to vector<16xf32>
    %155 = vector.shape_cast %154 : vector<16xf32> to vector<16x1xf32>
    %156 = tpu.reciprocal %155 {approx = true} : vector<16x1xf32> -> vector<16x1xf32>
    %157 = vector.broadcast %156 : vector<16x1xf32> to vector<16x16xf32>
    %158 = arith.mulf %153, %157 : vector<16x16xf32>
    %cst_71 = arith.constant dense<0.000000e+00> : vector<16x32xf32>
    %159 = tpu.matmul %158, %87, %cst_71 {dimension_numbers = #tpu.dot_dimension_numbers<[1], [0], [0], [1], [0, 0, 1, 1], [], []>} : vector<16x16xf32>, vector<16x32xf32>, vector<16x32xf32> -> vector<16x32xf32>
    %160 = vector.broadcast %36 : vector<1x32xf32> to vector<16x32xf32>
    %161 = arith.mulf %159, %160 : vector<16x32xf32>
    %162 = arith.addf %144, %161 : vector<16x32xf32>
    %cst_72 = arith.constant dense<0.000000e+00> : vector<16x32xf32>
    %163 = tpu.matmul %162, %70, %cst_72 {dimension_numbers = #tpu.dot_dimension_numbers<[1], [0], [0], [1], [0, 0, 1, 1], [], []>} : vector<16x32xf32>, vector<32x32xf32>, vector<16x32xf32> -> vector<16x32xf32>
    %164 = vector.broadcast %78 : vector<1x32xf32> to vector<16x32xf32>
    %165 = arith.addf %163, %164 : vector<16x32xf32>
    %166 = arith.addf %62, %165 : vector<16x32xf32>
    %c0_73 = arith.constant 0 : index
    %c1_74 = arith.constant 1 : index
    %c0_75 = arith.constant 0 : index
    %167 = vector.load %arg9[%c0_73, %c1_74, %c0_75] : memref<1x5x32xf32, #tpu.memory_space<vmem>>, vector<1x1x32xf32>
    %168 = vector.shape_cast %167 : vector<1x1x32xf32> to vector<1x32xf32>
    %c0_76 = arith.constant 0 : index
    %c1_77 = arith.constant 1 : index
    %c0_78 = arith.constant 0 : index
    %169 = vector.load %arg10[%c0_76, %c1_77, %c0_78] : memref<1x5x32xf32, #tpu.memory_space<vmem>>, vector<1x1x32xf32>
    %170 = vector.shape_cast %169 : vector<1x1x32xf32> to vector<1x32xf32>
    %cst_79 = arith.constant dense<0.000000e+00> : vector<16xf32>
    %171 = vector.multi_reduction <add>, %166, %cst_79 [1] : vector<16x32xf32> to vector<16xf32>
    %172 = vector.shape_cast %171 : vector<16xf32> to vector<16x1xf32>
    %cst_80 = arith.constant 3.200000e+01 : f32
    %173 = vector.broadcast %cst_80 : f32 to vector<16x1xf32>
    %174 = arith.divf %172, %173 : vector<16x1xf32>
    %175 = vector.broadcast %174 : vector<16x1xf32> to vector<16x32xf32>
    %176 = arith.subf %166, %175 : vector<16x32xf32>
    %177 = arith.mulf %176, %176 : vector<16x32xf32>
    %cst_81 = arith.constant dense<0.000000e+00> : vector<16xf32>
    %178 = vector.multi_reduction <add>, %177, %cst_81 [1] : vector<16x32xf32> to vector<16xf32>
    %179 = vector.shape_cast %178 : vector<16xf32> to vector<16x1xf32>
    %cst_82 = arith.constant 3.200000e+01 : f32
    %180 = vector.broadcast %cst_82 : f32 to vector<16x1xf32>
    %181 = arith.divf %179, %180 : vector<16x1xf32>
    %182 = vector.broadcast %174 : vector<16x1xf32> to vector<16x32xf32>
    %183 = arith.subf %166, %182 : vector<16x32xf32>
    %cst_83 = arith.constant 9.99999996E-13 : f32
    %184 = vector.broadcast %cst_83 : f32 to vector<16x1xf32>
    %185 = arith.addf %181, %184 : vector<16x1xf32>
    %186 = math.rsqrt %185 : vector<16x1xf32>
    %187 = vector.broadcast %186 : vector<16x1xf32> to vector<16x32xf32>
    %188 = arith.mulf %183, %187 : vector<16x32xf32>
    %189 = vector.broadcast %168 : vector<1x32xf32> to vector<16x32xf32>
    %190 = arith.mulf %188, %189 : vector<16x32xf32>
    %191 = vector.broadcast %170 : vector<1x32xf32> to vector<16x32xf32>
    %192 = arith.addf %190, %191 : vector<16x32xf32>
    %c0_84 = arith.constant 0 : index
    %c0_85 = arith.constant 0 : index
    %c0_86 = arith.constant 0 : index
    %c0_87 = arith.constant 0 : index
    %193 = vector.load %arg5[%c0_84, %c0_85, %c0_86, %c0_87] : memref<1x2x32x64xf32, #tpu.memory_space<vmem>>, vector<1x1x32x64xf32>
    %194 = vector.shape_cast %193 : vector<1x1x32x64xf32> to vector<32x64xf32>
    %cst_88 = arith.constant dense<0.000000e+00> : vector<16x64xf32>
    %195 = tpu.matmul %192, %194, %cst_88 {dimension_numbers = #tpu.dot_dimension_numbers<[1], [0], [0], [1], [0, 0, 1, 1], [], []>} : vector<16x32xf32>, vector<32x64xf32>, vector<16x64xf32> -> vector<16x64xf32>
    %c0_89 = arith.constant 0 : index
    %c0_90 = arith.constant 0 : index
    %c0_91 = arith.constant 0 : index
    %196 = vector.load %arg6[%c0_89, %c0_90, %c0_91] : memref<1x2x64xf32, #tpu.memory_space<vmem>>, vector<1x1x64xf32>
    %197 = vector.shape_cast %196 : vector<1x1x64xf32> to vector<1x64xf32>
    %198 = vector.broadcast %197 : vector<1x64xf32> to vector<16x64xf32>
    %199 = arith.addf %195, %198 : vector<16x64xf32>
    %200 = arith.mulf %199, %199 : vector<16x64xf32>
    %201 = arith.mulf %199, %200 : vector<16x64xf32>
    %cst_92 = arith.constant 4.471500e-02 : f32
    %202 = vector.broadcast %cst_92 : f32 to vector<16x64xf32>
    %203 = arith.mulf %202, %201 : vector<16x64xf32>
    %204 = arith.addf %199, %203 : vector<16x64xf32>
    %cst_93 = arith.constant 0.797884583 : f32
    %205 = vector.broadcast %cst_93 : f32 to vector<16x64xf32>
    %206 = arith.mulf %205, %204 : vector<16x64xf32>
    %207 = math.tanh %206 : vector<16x64xf32>
    %cst_94 = arith.constant 1.000000e+00 : f32
    %208 = vector.broadcast %cst_94 : f32 to vector<16x64xf32>
    %209 = arith.addf %208, %207 : vector<16x64xf32>
    %cst_95 = arith.constant 5.000000e-01 : f32
    %210 = vector.broadcast %cst_95 : f32 to vector<16x64xf32>
    %211 = arith.mulf %210, %209 : vector<16x64xf32>
    %212 = arith.mulf %199, %211 : vector<16x64xf32>
    %c0_96 = arith.constant 0 : index
    %c0_97 = arith.constant 0 : index
    %c0_98 = arith.constant 0 : index
    %c0_99 = arith.constant 0 : index
    %213 = vector.load %arg7[%c0_96, %c0_97, %c0_98, %c0_99] : memref<1x2x64x32xf32, #tpu.memory_space<vmem>>, vector<1x1x64x32xf32>
    %214 = vector.shape_cast %213 : vector<1x1x64x32xf32> to vector<64x32xf32>
    %cst_100 = arith.constant dense<0.000000e+00> : vector<16x32xf32>
    %215 = tpu.matmul %212, %214, %cst_100 {dimension_numbers = #tpu.dot_dimension_numbers<[1], [0], [0], [1], [0, 0, 1, 1], [], []>} : vector<16x64xf32>, vector<64x32xf32>, vector<16x32xf32> -> vector<16x32xf32>
    %c0_101 = arith.constant 0 : index
    %c0_102 = arith.constant 0 : index
    %c0_103 = arith.constant 0 : index
    %216 = vector.load %arg8[%c0_101, %c0_102, %c0_103] : memref<1x2x32xf32, #tpu.memory_space<vmem>>, vector<1x1x32xf32>
    %217 = vector.shape_cast %216 : vector<1x1x32xf32> to vector<1x32xf32>
    %218 = vector.broadcast %217 : vector<1x32xf32> to vector<16x32xf32>
    %219 = arith.addf %215, %218 : vector<16x32xf32>
    %220 = arith.addf %192, %219 : vector<16x32xf32>
    %c0_104 = arith.constant 0 : index
    %c2_105 = arith.constant 2 : index
    %c0_106 = arith.constant 0 : index
    %221 = vector.load %arg9[%c0_104, %c2_105, %c0_106] : memref<1x5x32xf32, #tpu.memory_space<vmem>>, vector<1x1x32xf32>
    %222 = vector.shape_cast %221 : vector<1x1x32xf32> to vector<1x32xf32>
    %c0_107 = arith.constant 0 : index
    %c2_108 = arith.constant 2 : index
    %c0_109 = arith.constant 0 : index
    %223 = vector.load %arg10[%c0_107, %c2_108, %c0_109] : memref<1x5x32xf32, #tpu.memory_space<vmem>>, vector<1x1x32xf32>
    %224 = vector.shape_cast %223 : vector<1x1x32xf32> to vector<1x32xf32>
    %cst_110 = arith.constant dense<0.000000e+00> : vector<16xf32>
    %225 = vector.multi_reduction <add>, %220, %cst_110 [1] : vector<16x32xf32> to vector<16xf32>
    %226 = vector.shape_cast %225 : vector<16xf32> to vector<16x1xf32>
    %cst_111 = arith.constant 3.200000e+01 : f32
    %227 = vector.broadcast %cst_111 : f32 to vector<16x1xf32>
    %228 = arith.divf %226, %227 : vector<16x1xf32>
    %229 = vector.broadcast %228 : vector<16x1xf32> to vector<16x32xf32>
    %230 = arith.subf %220, %229 : vector<16x32xf32>
    %231 = arith.mulf %230, %230 : vector<16x32xf32>
    %cst_112 = arith.constant dense<0.000000e+00> : vector<16xf32>
    %232 = vector.multi_reduction <add>, %231, %cst_112 [1] : vector<16x32xf32> to vector<16xf32>
    %233 = vector.shape_cast %232 : vector<16xf32> to vector<16x1xf32>
    %cst_113 = arith.constant 3.200000e+01 : f32
    %234 = vector.broadcast %cst_113 : f32 to vector<16x1xf32>
    %235 = arith.divf %233, %234 : vector<16x1xf32>
    %236 = vector.broadcast %228 : vector<16x1xf32> to vector<16x32xf32>
    %237 = arith.subf %220, %236 : vector<16x32xf32>
    %cst_114 = arith.constant 9.99999996E-13 : f32
    %238 = vector.broadcast %cst_114 : f32 to vector<16x1xf32>
    %239 = arith.addf %235, %238 : vector<16x1xf32>
    %240 = math.rsqrt %239 : vector<16x1xf32>
    %241 = vector.broadcast %240 : vector<16x1xf32> to vector<16x32xf32>
    %242 = arith.mulf %237, %241 : vector<16x32xf32>
    %243 = vector.broadcast %222 : vector<1x32xf32> to vector<16x32xf32>
    %244 = arith.mulf %242, %243 : vector<16x32xf32>
    %245 = vector.broadcast %224 : vector<1x32xf32> to vector<16x32xf32>
    %246 = arith.addf %244, %245 : vector<16x32xf32>
    %c0_115 = arith.constant 0 : index
    %c4 = arith.constant 4 : index
    %c0_116 = arith.constant 0 : index
    %c0_117 = arith.constant 0 : index
    %247 = vector.load %arg3[%c0_115, %c4, %c0_116, %c0_117] : memref<1x8x32x32xf32, #tpu.memory_space<vmem>>, vector<1x1x32x32xf32>
    %248 = vector.shape_cast %247 : vector<1x1x32x32xf32> to vector<32x32xf32>
    %c0_118 = arith.constant 0 : index
    %c5 = arith.constant 5 : index
    %c0_119 = arith.constant 0 : index
    %c0_120 = arith.constant 0 : index
    %249 = vector.load %arg3[%c0_118, %c5, %c0_119, %c0_120] : memref<1x8x32x32xf32, #tpu.memory_space<vmem>>, vector<1x1x32x32xf32>
    %250 = vector.shape_cast %249 : vector<1x1x32x32xf32> to vector<32x32xf32>
    %c0_121 = arith.constant 0 : index
    %c6 = arith.constant 6 : index
    %c0_122 = arith.constant 0 : index
    %c0_123 = arith.constant 0 : index
    %251 = vector.load %arg3[%c0_121, %c6, %c0_122, %c0_123] : memref<1x8x32x32xf32, #tpu.memory_space<vmem>>, vector<1x1x32x32xf32>
    %252 = vector.shape_cast %251 : vector<1x1x32x32xf32> to vector<32x32xf32>
    %c0_124 = arith.constant 0 : index
    %c7 = arith.constant 7 : index
    %c0_125 = arith.constant 0 : index
    %c0_126 = arith.constant 0 : index
    %253 = vector.load %arg3[%c0_124, %c7, %c0_125, %c0_126] : memref<1x8x32x32xf32, #tpu.memory_space<vmem>>, vector<1x1x32x32xf32>
    %254 = vector.shape_cast %253 : vector<1x1x32x32xf32> to vector<32x32xf32>
    %c0_127 = arith.constant 0 : index
    %c4_128 = arith.constant 4 : index
    %c0_129 = arith.constant 0 : index
    %255 = vector.load %arg4[%c0_127, %c4_128, %c0_129] : memref<1x8x32xf32, #tpu.memory_space<vmem>>, vector<1x1x32xf32>
    %256 = vector.shape_cast %255 : vector<1x1x32xf32> to vector<1x32xf32>
    %c0_130 = arith.constant 0 : index
    %c5_131 = arith.constant 5 : index
    %c0_132 = arith.constant 0 : index
    %257 = vector.load %arg4[%c0_130, %c5_131, %c0_132] : memref<1x8x32xf32, #tpu.memory_space<vmem>>, vector<1x1x32xf32>
    %258 = vector.shape_cast %257 : vector<1x1x32xf32> to vector<1x32xf32>
    %c0_133 = arith.constant 0 : index
    %c6_134 = arith.constant 6 : index
    %c0_135 = arith.constant 0 : index
    %259 = vector.load %arg4[%c0_133, %c6_134, %c0_135] : memref<1x8x32xf32, #tpu.memory_space<vmem>>, vector<1x1x32xf32>
    %260 = vector.shape_cast %259 : vector<1x1x32xf32> to vector<1x32xf32>
    %c0_136 = arith.constant 0 : index
    %c7_137 = arith.constant 7 : index
    %c0_138 = arith.constant 0 : index
    %261 = vector.load %arg4[%c0_136, %c7_137, %c0_138] : memref<1x8x32xf32, #tpu.memory_space<vmem>>, vector<1x1x32xf32>
    %262 = vector.shape_cast %261 : vector<1x1x32xf32> to vector<1x32xf32>
    %cst_139 = arith.constant dense<0.000000e+00> : vector<16x32xf32>
    %263 = tpu.matmul %246, %248, %cst_139 {dimension_numbers = #tpu.dot_dimension_numbers<[1], [0], [0], [1], [0, 0, 1, 1], [], []>} : vector<16x32xf32>, vector<32x32xf32>, vector<16x32xf32> -> vector<16x32xf32>
    %264 = vector.broadcast %256 : vector<1x32xf32> to vector<16x32xf32>
    %265 = arith.addf %263, %264 : vector<16x32xf32>
    %cst_140 = arith.constant dense<0.000000e+00> : vector<16x32xf32>
    %266 = tpu.matmul %246, %250, %cst_140 {dimension_numbers = #tpu.dot_dimension_numbers<[1], [0], [0], [1], [0, 0, 1, 1], [], []>} : vector<16x32xf32>, vector<32x32xf32>, vector<16x32xf32> -> vector<16x32xf32>
    %267 = vector.broadcast %258 : vector<1x32xf32> to vector<16x32xf32>
    %268 = arith.addf %266, %267 : vector<16x32xf32>
    %cst_141 = arith.constant dense<0.000000e+00> : vector<16x32xf32>
    %269 = tpu.matmul %246, %252, %cst_141 {dimension_numbers = #tpu.dot_dimension_numbers<[1], [0], [0], [1], [0, 0, 1, 1], [], []>} : vector<16x32xf32>, vector<32x32xf32>, vector<16x32xf32> -> vector<16x32xf32>
    %270 = vector.broadcast %260 : vector<1x32xf32> to vector<16x32xf32>
    %271 = arith.addf %269, %270 : vector<16x32xf32>
    %cst_142 = arith.constant 0.353553385 : f32
    %272 = vector.broadcast %cst_142 : f32 to vector<16x32xf32>
    %273 = arith.mulf %265, %272 : vector<16x32xf32>
    %cst_143 = arith.constant 0.000000e+00 : f32
    %274 = vector.broadcast %cst_143 : f32 to vector<16x32xf32>
    %275 = vector.broadcast %12 : vector<1x32xf32> to vector<16x32xf32>
    %276 = arith.mulf %268, %275 : vector<16x32xf32>
    %cst_144 = arith.constant dense<0.000000e+00> : vector<16x16xf32>
    %277 = tpu.matmul %273, %276, %cst_144 {dimension_numbers = #tpu.dot_dimension_numbers<[1], [1], [0], [0], [0, 0, 1, 0], [], []>} : vector<16x32xf32>, vector<16x32xf32>, vector<16x16xf32> -> vector<16x16xf32>
    %278 = arith.addf %277, %3 : vector<16x16xf32>
    %cst_145 = arith.constant dense<0xFF800000> : vector<16xf32>
    %279 = vector.multi_reduction <maximumf>, %278, %cst_145 [1] : vector<16x16xf32> to vector<16xf32>
    %280 = vector.shape_cast %279 : vector<16xf32> to vector<16x1xf32>
    %281 = vector.broadcast %280 : vector<16x1xf32> to vector<16x16xf32>
    %282 = arith.subf %278, %281 : vector<16x16xf32>
    %283 = math.exp %282 : vector<16x16xf32>
    %cst_146 = arith.constant dense<0.000000e+00> : vector<16xf32>
    %284 = vector.multi_reduction <add>, %283, %cst_146 [1] : vector<16x16xf32> to vector<16xf32>
    %285 = vector.shape_cast %284 : vector<16xf32> to vector<16x1xf32>
    %286 = tpu.reciprocal %285 {approx = true} : vector<16x1xf32> -> vector<16x1xf32>
    %287 = vector.broadcast %286 : vector<16x1xf32> to vector<16x16xf32>
    %288 = arith.mulf %283, %287 : vector<16x16xf32>
    %cst_147 = arith.constant dense<0.000000e+00> : vector<16x32xf32>
    %289 = tpu.matmul %288, %271, %cst_147 {dimension_numbers = #tpu.dot_dimension_numbers<[1], [0], [0], [1], [0, 0, 1, 1], [], []>} : vector<16x16xf32>, vector<16x32xf32>, vector<16x32xf32> -> vector<16x32xf32>
    %290 = vector.broadcast %12 : vector<1x32xf32> to vector<16x32xf32>
    %291 = arith.mulf %289, %290 : vector<16x32xf32>
    %292 = arith.addf %274, %291 : vector<16x32xf32>
    %293 = vector.broadcast %20 : vector<1x32xf32> to vector<16x32xf32>
    %294 = arith.mulf %268, %293 : vector<16x32xf32>
    %cst_148 = arith.constant dense<0.000000e+00> : vector<16x16xf32>
    %295 = tpu.matmul %273, %294, %cst_148 {dimension_numbers = #tpu.dot_dimension_numbers<[1], [1], [0], [0], [0, 0, 1, 0], [], []>} : vector<16x32xf32>, vector<16x32xf32>, vector<16x16xf32> -> vector<16x16xf32>
    %296 = arith.addf %295, %3 : vector<16x16xf32>
    %cst_149 = arith.constant dense<0xFF800000> : vector<16xf32>
    %297 = vector.multi_reduction <maximumf>, %296, %cst_149 [1] : vector<16x16xf32> to vector<16xf32>
    %298 = vector.shape_cast %297 : vector<16xf32> to vector<16x1xf32>
    %299 = vector.broadcast %298 : vector<16x1xf32> to vector<16x16xf32>
    %300 = arith.subf %296, %299 : vector<16x16xf32>
    %301 = math.exp %300 : vector<16x16xf32>
    %cst_150 = arith.constant dense<0.000000e+00> : vector<16xf32>
    %302 = vector.multi_reduction <add>, %301, %cst_150 [1] : vector<16x16xf32> to vector<16xf32>
    %303 = vector.shape_cast %302 : vector<16xf32> to vector<16x1xf32>
    %304 = tpu.reciprocal %303 {approx = true} : vector<16x1xf32> -> vector<16x1xf32>
    %305 = vector.broadcast %304 : vector<16x1xf32> to vector<16x16xf32>
    %306 = arith.mulf %301, %305 : vector<16x16xf32>
    %cst_151 = arith.constant dense<0.000000e+00> : vector<16x32xf32>
    %307 = tpu.matmul %306, %271, %cst_151 {dimension_numbers = #tpu.dot_dimension_numbers<[1], [0], [0], [1], [0, 0, 1, 1], [], []>} : vector<16x16xf32>, vector<16x32xf32>, vector<16x32xf32> -> vector<16x32xf32>
    %308 = vector.broadcast %20 : vector<1x32xf32> to vector<16x32xf32>
    %309 = arith.mulf %307, %308 : vector<16x32xf32>
    %310 = arith.addf %292, %309 : vector<16x32xf32>
    %311 = vector.broadcast %28 : vector<1x32xf32> to vector<16x32xf32>
    %312 = arith.mulf %268, %311 : vector<16x32xf32>
    %cst_152 = arith.constant dense<0.000000e+00> : vector<16x16xf32>
    %313 = tpu.matmul %273, %312, %cst_152 {dimension_numbers = #tpu.dot_dimension_numbers<[1], [1], [0], [0], [0, 0, 1, 0], [], []>} : vector<16x32xf32>, vector<16x32xf32>, vector<16x16xf32> -> vector<16x16xf32>
    %314 = arith.addf %313, %3 : vector<16x16xf32>
    %cst_153 = arith.constant dense<0xFF800000> : vector<16xf32>
    %315 = vector.multi_reduction <maximumf>, %314, %cst_153 [1] : vector<16x16xf32> to vector<16xf32>
    %316 = vector.shape_cast %315 : vector<16xf32> to vector<16x1xf32>
    %317 = vector.broadcast %316 : vector<16x1xf32> to vector<16x16xf32>
    %318 = arith.subf %314, %317 : vector<16x16xf32>
    %319 = math.exp %318 : vector<16x16xf32>
    %cst_154 = arith.constant dense<0.000000e+00> : vector<16xf32>
    %320 = vector.multi_reduction <add>, %319, %cst_154 [1] : vector<16x16xf32> to vector<16xf32>
    %321 = vector.shape_cast %320 : vector<16xf32> to vector<16x1xf32>
    %322 = tpu.reciprocal %321 {approx = true} : vector<16x1xf32> -> vector<16x1xf32>
    %323 = vector.broadcast %322 : vector<16x1xf32> to vector<16x16xf32>
    %324 = arith.mulf %319, %323 : vector<16x16xf32>
    %cst_155 = arith.constant dense<0.000000e+00> : vector<16x32xf32>
    %325 = tpu.matmul %324, %271, %cst_155 {dimension_numbers = #tpu.dot_dimension_numbers<[1], [0], [0], [1], [0, 0, 1, 1], [], []>} : vector<16x16xf32>, vector<16x32xf32>, vector<16x32xf32> -> vector<16x32xf32>
    %326 = vector.broadcast %28 : vector<1x32xf32> to vector<16x32xf32>
    %327 = arith.mulf %325, %326 : vector<16x32xf32>
    %328 = arith.addf %310, %327 : vector<16x32xf32>
    %329 = vector.broadcast %36 : vector<1x32xf32> to vector<16x32xf32>
    %330 = arith.mulf %268, %329 : vector<16x32xf32>
    %cst_156 = arith.constant dense<0.000000e+00> : vector<16x16xf32>
    %331 = tpu.matmul %273, %330, %cst_156 {dimension_numbers = #tpu.dot_dimension_numbers<[1], [1], [0], [0], [0, 0, 1, 0], [], []>} : vector<16x32xf32>, vector<16x32xf32>, vector<16x16xf32> -> vector<16x16xf32>
    %332 = arith.addf %331, %3 : vector<16x16xf32>
    %cst_157 = arith.constant dense<0xFF800000> : vector<16xf32>
    %333 = vector.multi_reduction <maximumf>, %332, %cst_157 [1] : vector<16x16xf32> to vector<16xf32>
    %334 = vector.shape_cast %333 : vector<16xf32> to vector<16x1xf32>
    %335 = vector.broadcast %334 : vector<16x1xf32> to vector<16x16xf32>
    %336 = arith.subf %332, %335 : vector<16x16xf32>
    %337 = math.exp %336 : vector<16x16xf32>
    %cst_158 = arith.constant dense<0.000000e+00> : vector<16xf32>
    %338 = vector.multi_reduction <add>, %337, %cst_158 [1] : vector<16x16xf32> to vector<16xf32>
    %339 = vector.shape_cast %338 : vector<16xf32> to vector<16x1xf32>
    %340 = tpu.reciprocal %339 {approx = true} : vector<16x1xf32> -> vector<16x1xf32>
    %341 = vector.broadcast %340 : vector<16x1xf32> to vector<16x16xf32>
    %342 = arith.mulf %337, %341 : vector<16x16xf32>
    %cst_159 = arith.constant dense<0.000000e+00> : vector<16x32xf32>
    %343 = tpu.matmul %342, %271, %cst_159 {dimension_numbers = #tpu.dot_dimension_numbers<[1], [0], [0], [1], [0, 0, 1, 1], [], []>} : vector<16x16xf32>, vector<16x32xf32>, vector<16x32xf32> -> vector<16x32xf32>
    %344 = vector.broadcast %36 : vector<1x32xf32> to vector<16x32xf32>
    %345 = arith.mulf %343, %344 : vector<16x32xf32>
    %346 = arith.addf %328, %345 : vector<16x32xf32>
    %cst_160 = arith.constant dense<0.000000e+00> : vector<16x32xf32>
    %347 = tpu.matmul %346, %254, %cst_160 {dimension_numbers = #tpu.dot_dimension_numbers<[1], [0], [0], [1], [0, 0, 1, 1], [], []>} : vector<16x32xf32>, vector<32x32xf32>, vector<16x32xf32> -> vector<16x32xf32>
    %348 = vector.broadcast %262 : vector<1x32xf32> to vector<16x32xf32>
    %349 = arith.addf %347, %348 : vector<16x32xf32>
    %350 = arith.addf %246, %349 : vector<16x32xf32>
    %c0_161 = arith.constant 0 : index
    %c3_162 = arith.constant 3 : index
    %c0_163 = arith.constant 0 : index
    %351 = vector.load %arg9[%c0_161, %c3_162, %c0_163] : memref<1x5x32xf32, #tpu.memory_space<vmem>>, vector<1x1x32xf32>
    %352 = vector.shape_cast %351 : vector<1x1x32xf32> to vector<1x32xf32>
    %c0_164 = arith.constant 0 : index
    %c3_165 = arith.constant 3 : index
    %c0_166 = arith.constant 0 : index
    %353 = vector.load %arg10[%c0_164, %c3_165, %c0_166] : memref<1x5x32xf32, #tpu.memory_space<vmem>>, vector<1x1x32xf32>
    %354 = vector.shape_cast %353 : vector<1x1x32xf32> to vector<1x32xf32>
    %cst_167 = arith.constant dense<0.000000e+00> : vector<16xf32>
    %355 = vector.multi_reduction <add>, %350, %cst_167 [1] : vector<16x32xf32> to vector<16xf32>
    %356 = vector.shape_cast %355 : vector<16xf32> to vector<16x1xf32>
    %cst_168 = arith.constant 3.200000e+01 : f32
    %357 = vector.broadcast %cst_168 : f32 to vector<16x1xf32>
    %358 = arith.divf %356, %357 : vector<16x1xf32>
    %359 = vector.broadcast %358 : vector<16x1xf32> to vector<16x32xf32>
    %360 = arith.subf %350, %359 : vector<16x32xf32>
    %361 = arith.mulf %360, %360 : vector<16x32xf32>
    %cst_169 = arith.constant dense<0.000000e+00> : vector<16xf32>
    %362 = vector.multi_reduction <add>, %361, %cst_169 [1] : vector<16x32xf32> to vector<16xf32>
    %363 = vector.shape_cast %362 : vector<16xf32> to vector<16x1xf32>
    %cst_170 = arith.constant 3.200000e+01 : f32
    %364 = vector.broadcast %cst_170 : f32 to vector<16x1xf32>
    %365 = arith.divf %363, %364 : vector<16x1xf32>
    %366 = vector.broadcast %358 : vector<16x1xf32> to vector<16x32xf32>
    %367 = arith.subf %350, %366 : vector<16x32xf32>
    %cst_171 = arith.constant 9.99999996E-13 : f32
    %368 = vector.broadcast %cst_171 : f32 to vector<16x1xf32>
    %369 = arith.addf %365, %368 : vector<16x1xf32>
    %370 = math.rsqrt %369 : vector<16x1xf32>
    %371 = vector.broadcast %370 : vector<16x1xf32> to vector<16x32xf32>
    %372 = arith.mulf %367, %371 : vector<16x32xf32>
    %373 = vector.broadcast %352 : vector<1x32xf32> to vector<16x32xf32>
    %374 = arith.mulf %372, %373 : vector<16x32xf32>
    %375 = vector.broadcast %354 : vector<1x32xf32> to vector<16x32xf32>
    %376 = arith.addf %374, %375 : vector<16x32xf32>
    %c0_172 = arith.constant 0 : index
    %c1_173 = arith.constant 1 : index
    %c0_174 = arith.constant 0 : index
    %c0_175 = arith.constant 0 : index
    %377 = vector.load %arg5[%c0_172, %c1_173, %c0_174, %c0_175] : memref<1x2x32x64xf32, #tpu.memory_space<vmem>>, vector<1x1x32x64xf32>
    %378 = vector.shape_cast %377 : vector<1x1x32x64xf32> to vector<32x64xf32>
    %cst_176 = arith.constant dense<0.000000e+00> : vector<16x64xf32>
    %379 = tpu.matmul %376, %378, %cst_176 {dimension_numbers = #tpu.dot_dimension_numbers<[1], [0], [0], [1], [0, 0, 1, 1], [], []>} : vector<16x32xf32>, vector<32x64xf32>, vector<16x64xf32> -> vector<16x64xf32>
    %c0_177 = arith.constant 0 : index
    %c1_178 = arith.constant 1 : index
    %c0_179 = arith.constant 0 : index
    %380 = vector.load %arg6[%c0_177, %c1_178, %c0_179] : memref<1x2x64xf32, #tpu.memory_space<vmem>>, vector<1x1x64xf32>
    %381 = vector.shape_cast %380 : vector<1x1x64xf32> to vector<1x64xf32>
    %382 = vector.broadcast %381 : vector<1x64xf32> to vector<16x64xf32>
    %383 = arith.addf %379, %382 : vector<16x64xf32>
    %384 = arith.mulf %383, %383 : vector<16x64xf32>
    %385 = arith.mulf %383, %384 : vector<16x64xf32>
    %cst_180 = arith.constant 4.471500e-02 : f32
    %386 = vector.broadcast %cst_180 : f32 to vector<16x64xf32>
    %387 = arith.mulf %386, %385 : vector<16x64xf32>
    %388 = arith.addf %383, %387 : vector<16x64xf32>
    %cst_181 = arith.constant 0.797884583 : f32
    %389 = vector.broadcast %cst_181 : f32 to vector<16x64xf32>
    %390 = arith.mulf %389, %388 : vector<16x64xf32>
    %391 = math.tanh %390 : vector<16x64xf32>
    %cst_182 = arith.constant 1.000000e+00 : f32
    %392 = vector.broadcast %cst_182 : f32 to vector<16x64xf32>
    %393 = arith.addf %392, %391 : vector<16x64xf32>
    %cst_183 = arith.constant 5.000000e-01 : f32
    %394 = vector.broadcast %cst_183 : f32 to vector<16x64xf32>
    %395 = arith.mulf %394, %393 : vector<16x64xf32>
    %396 = arith.mulf %383, %395 : vector<16x64xf32>
    %c0_184 = arith.constant 0 : index
    %c1_185 = arith.constant 1 : index
    %c0_186 = arith.constant 0 : index
    %c0_187 = arith.constant 0 : index
    %397 = vector.load %arg7[%c0_184, %c1_185, %c0_186, %c0_187] : memref<1x2x64x32xf32, #tpu.memory_space<vmem>>, vector<1x1x64x32xf32>
    %398 = vector.shape_cast %397 : vector<1x1x64x32xf32> to vector<64x32xf32>
    %cst_188 = arith.constant dense<0.000000e+00> : vector<16x32xf32>
    %399 = tpu.matmul %396, %398, %cst_188 {dimension_numbers = #tpu.dot_dimension_numbers<[1], [0], [0], [1], [0, 0, 1, 1], [], []>} : vector<16x64xf32>, vector<64x32xf32>, vector<16x32xf32> -> vector<16x32xf32>
    %c0_189 = arith.constant 0 : index
    %c1_190 = arith.constant 1 : index
    %c0_191 = arith.constant 0 : index
    %400 = vector.load %arg8[%c0_189, %c1_190, %c0_191] : memref<1x2x32xf32, #tpu.memory_space<vmem>>, vector<1x1x32xf32>
    %401 = vector.shape_cast %400 : vector<1x1x32xf32> to vector<1x32xf32>
    %402 = vector.broadcast %401 : vector<1x32xf32> to vector<16x32xf32>
    %403 = arith.addf %399, %402 : vector<16x32xf32>
    %404 = arith.addf %376, %403 : vector<16x32xf32>
    %c0_192 = arith.constant 0 : index
    %c4_193 = arith.constant 4 : index
    %c0_194 = arith.constant 0 : index
    %405 = vector.load %arg9[%c0_192, %c4_193, %c0_194] : memref<1x5x32xf32, #tpu.memory_space<vmem>>, vector<1x1x32xf32>
    %406 = vector.shape_cast %405 : vector<1x1x32xf32> to vector<1x32xf32>
    %c0_195 = arith.constant 0 : index
    %c4_196 = arith.constant 4 : index
    %c0_197 = arith.constant 0 : index
    %407 = vector.load %arg10[%c0_195, %c4_196, %c0_197] : memref<1x5x32xf32, #tpu.memory_space<vmem>>, vector<1x1x32xf32>
    %408 = vector.shape_cast %407 : vector<1x1x32xf32> to vector<1x32xf32>
    %cst_198 = arith.constant dense<0.000000e+00> : vector<16xf32>
    %409 = vector.multi_reduction <add>, %404, %cst_198 [1] : vector<16x32xf32> to vector<16xf32>
    %410 = vector.shape_cast %409 : vector<16xf32> to vector<16x1xf32>
    %cst_199 = arith.constant 3.200000e+01 : f32
    %411 = vector.broadcast %cst_199 : f32 to vector<16x1xf32>
    %412 = arith.divf %410, %411 : vector<16x1xf32>
    %413 = vector.broadcast %412 : vector<16x1xf32> to vector<16x32xf32>
    %414 = arith.subf %404, %413 : vector<16x32xf32>
    %415 = arith.mulf %414, %414 : vector<16x32xf32>
    %cst_200 = arith.constant dense<0.000000e+00> : vector<16xf32>
    %416 = vector.multi_reduction <add>, %415, %cst_200 [1] : vector<16x32xf32> to vector<16xf32>
    %417 = vector.shape_cast %416 : vector<16xf32> to vector<16x1xf32>
    %cst_201 = arith.constant 3.200000e+01 : f32
    %418 = vector.broadcast %cst_201 : f32 to vector<16x1xf32>
    %419 = arith.divf %417, %418 : vector<16x1xf32>
    %420 = vector.broadcast %412 : vector<16x1xf32> to vector<16x32xf32>
    %421 = arith.subf %404, %420 : vector<16x32xf32>
    %cst_202 = arith.constant 9.99999996E-13 : f32
    %422 = vector.broadcast %cst_202 : f32 to vector<16x1xf32>
    %423 = arith.addf %419, %422 : vector<16x1xf32>
    %424 = math.rsqrt %423 : vector<16x1xf32>
    %425 = vector.broadcast %424 : vector<16x1xf32> to vector<16x32xf32>
    %426 = arith.mulf %421, %425 : vector<16x32xf32>
    %427 = vector.broadcast %406 : vector<1x32xf32> to vector<16x32xf32>
    %428 = arith.mulf %426, %427 : vector<16x32xf32>
    %429 = vector.broadcast %408 : vector<1x32xf32> to vector<16x32xf32>
    %430 = arith.addf %428, %429 : vector<16x32xf32>
    %431 = tpu.iota {dimensions = array<i32: 0>} : vector<2x16xi32>
    %432 = tpu.iota {dimensions = array<i32: 1>} : vector<2x16xi32>
    %c8_i32_203 = arith.constant 8 : i32
    %433 = vector.broadcast %c8_i32_203 : i32 to vector<2x16xi32>
    %434 = arith.muli %431, %433 : vector<2x16xi32>
    %435 = arith.cmpi eq, %432, %434 : vector<2x16xi32>
    %cst_204 = arith.constant 1.000000e+00 : f32
    %cst_205 = arith.constant 0.000000e+00 : f32
    %436 = vector.broadcast %cst_204 : f32 to vector<2x16xf32>
    %437 = vector.broadcast %cst_205 : f32 to vector<2x16xf32>
    %438 = arith.select %435, %436, %437 : vector<2x16xi1>, vector<2x16xf32>
    %cst_206 = arith.constant dense<0.000000e+00> : vector<2x32xf32>
    %439 = tpu.matmul %438, %430, %cst_206 {dimension_numbers = #tpu.dot_dimension_numbers<[1], [0], [0], [1], [0, 0, 1, 1], [], []>} : vector<2x16xf32>, vector<16x32xf32>, vector<2x32xf32> -> vector<2x32xf32>
    %c0_207 = arith.constant 0 : index
    %c0_208 = arith.constant 0 : index
    %c0_209 = arith.constant 0 : index
    %440 = vector.load %arg11[%c0_207, %c0_208, %c0_209] : memref<1x32x32xf32, #tpu.memory_space<vmem>>, vector<1x32x32xf32>
    %441 = vector.shape_cast %440 : vector<1x32x32xf32> to vector<32x32xf32>
    %cst_210 = arith.constant dense<0.000000e+00> : vector<2x32xf32>
    %442 = tpu.matmul %439, %441, %cst_210 {dimension_numbers = #tpu.dot_dimension_numbers<[1], [0], [0], [1], [0, 0, 1, 1], [], []>} : vector<2x32xf32>, vector<32x32xf32>, vector<2x32xf32> -> vector<2x32xf32>
    %c0_211 = arith.constant 0 : index
    %c0_212 = arith.constant 0 : index
    %c0_213 = arith.constant 0 : index
    %443 = vector.load %arg12[%c0_211, %c0_212, %c0_213] : memref<1x1x32xf32, #tpu.memory_space<vmem>>, vector<1x1x32xf32>
    %444 = vector.shape_cast %443 : vector<1x1x32xf32> to vector<1x32xf32>
    %445 = vector.broadcast %444 : vector<1x32xf32> to vector<2x32xf32>
    %446 = arith.addf %442, %445 : vector<2x32xf32>
    %447 = math.tanh %446 : vector<2x32xf32>
    %c0_214 = arith.constant 0 : index
    %c0_215 = arith.constant 0 : index
    %c0_216 = arith.constant 0 : index
    %448 = vector.load %arg13[%c0_214, %c0_215, %c0_216] : memref<1x32x128xf32, #tpu.memory_space<vmem>>, vector<1x32x128xf32>
    %449 = vector.shape_cast %448 : vector<1x32x128xf32> to vector<32x128xf32>
    %cst_217 = arith.constant dense<0.000000e+00> : vector<2x128xf32>
    %450 = tpu.matmul %447, %449, %cst_217 {dimension_numbers = #tpu.dot_dimension_numbers<[1], [0], [0], [1], [0, 0, 1, 1], [], []>} : vector<2x32xf32>, vector<32x128xf32>, vector<2x128xf32> -> vector<2x128xf32>
    %c0_218 = arith.constant 0 : index
    %c0_219 = arith.constant 0 : index
    %c0_220 = arith.constant 0 : index
    %451 = vector.load %arg14[%c0_218, %c0_219, %c0_220] : memref<1x1x128xf32, #tpu.memory_space<vmem>>, vector<1x1x128xf32>
    %452 = vector.shape_cast %451 : vector<1x1x128xf32> to vector<1x128xf32>
    %453 = vector.broadcast %452 : vector<1x128xf32> to vector<2x128xf32>
    %454 = arith.addf %450, %453 : vector<2x128xf32>
    %c0_221 = arith.constant 0 : index
    %c0_222 = arith.constant 0 : index
    %c0_223 = arith.constant 0 : index
    %455 = vector.load %arg15[%c0_221, %c0_222, %c0_223] : memref<1x2x128xf32, #tpu.memory_space<vmem>>, vector<1x2x128xf32>
    %456 = vector.shape_cast %455 : vector<1x2x128xf32> to vector<2x128xf32>
    %457 = vector.shape_cast %454 : vector<2x128xf32> to vector<1x2x128xf32>
    tpu.vector_store %arg15[%c0_221, %c0_222, %c0_223], %457 {strides = array<i32>} : memref<1x2x128xf32, #tpu.memory_space<vmem>>, vector<1x2x128xf32>,
    return
  }
  func.func @transform_0(%arg0: i32) -> (i32, i32, i32) {
    %c0_i32 = arith.constant 0 : i32
    %c0_i32_0 = arith.constant 0 : i32
    %c0_i32_1 = arith.constant 0 : i32
    return %arg0, %c0_i32, %c0_i32_0 : i32, i32, i32
  }
  func.func @transform_1(%arg0: i32) -> (i32, i32, i32) {
    %c0_i32 = arith.constant 0 : i32
    %c0_i32_0 = arith.constant 0 : i32
    %c0_i32_1 = arith.constant 0 : i32
    return %arg0, %c0_i32, %c0_i32_0 : i32, i32, i32
  }
  func.func @transform_2(%arg0: i32) -> (i32, i32, i32, i32) {
    %c0_i32 = arith.constant 0 : i32
    %c0_i32_0 = arith.constant 0 : i32
    %c0_i32_1 = arith.constant 0 : i32
    %c0_i32_2 = arith.constant 0 : i32
    return %arg0, %c0_i32, %c0_i32_0, %c0_i32_1 : i32, i32, i32, i32
  }
  func.func @transform_3(%arg0: i32) -> (i32, i32, i32) {
    %c0_i32 = arith.constant 0 : i32
    %c0_i32_0 = arith.constant 0 : i32
    %c0_i32_1 = arith.constant 0 : i32
    return %arg0, %c0_i32, %c0_i32_0 : i32, i32, i32
  }
  func.func @transform_4(%arg0: i32) -> (i32, i32, i32, i32) {
    %c0_i32 = arith.constant 0 : i32
    %c0_i32_0 = arith.constant 0 : i32
    %c0_i32_1 = arith.constant 0 : i32
    %c0_i32_2 = arith.constant 0 : i32
    return %arg0, %c0_i32, %c0_i32_0, %c0_i32_1 : i32, i32, i32, i32
  }
  func.func @transform_5(%arg0: i32) -> (i32, i32, i32) {
    %c0_i32 = arith.constant 0 : i32
    %c0_i32_0 = arith.constant 0 : i32
    %c0_i32_1 = arith.constant 0 : i32
    return %arg0, %c0_i32, %c0_i32_0 : i32, i32, i32
  }
  func.func @transform_6(%arg0: i32) -> (i32, i32, i32, i32) {
    %c0_i32 = arith.constant 0 : i32
    %c0_i32_0 = arith.constant 0 : i32
    %c0_i32_1 = arith.constant 0 : i32
    %c0_i32_2 = arith.constant 0 : i32
    return %arg0, %c0_i32, %c0_i32_0, %c0_i32_1 : i32, i32, i32, i32
  }
  func.func @transform_7(%arg0: i32) -> (i32, i32, i32) {
    %c0_i32 = arith.constant 0 : i32
    %c0_i32_0 = arith.constant 0 : i32
    %c0_i32_1 = arith.constant 0 : i32
    return %arg0, %c0_i32, %c0_i32_0 : i32, i32, i32
  }
  func.func @transform_8(%arg0: i32) -> (i32, i32, i32) {
    %c0_i32 = arith.constant 0 : i32
    %c0_i32_0 = arith.constant 0 : i32
    %c0_i32_1 = arith.constant 0 : i32
    return %arg0, %c0_i32, %c0_i32_0 : i32, i32, i32
  }
  func.func @transform_9(%arg0: i32) -> (i32, i32, i32) {
    %c0_i32 = arith.constant 0 : i32
    %c0_i32_0 = arith.constant 0 : i32
    %c0_i32_1 = arith.constant 0 : i32
    return %arg0, %c0_i32, %c0_i32_0 : i32, i32, i32
  }
  func.func @transform_10(%arg0: i32) -> (i32, i32, i32) {
    %c0_i32 = arith.constant 0 : i32
    %c0_i32_0 = arith.constant 0 : i32
    %c0_i32_1 = arith.constant 0 : i32
    return %arg0, %c0_i32, %c0_i32_0 : i32, i32, i32
  }
  func.func @transform_11(%arg0: i32) -> (i32, i32, i32) {
    %c0_i32 = arith.constant 0 : i32
    %c0_i32_0 = arith.constant 0 : i32
    %c0_i32_1 = arith.constant 0 : i32
    return %arg0, %c0_i32, %c0_i32_0 : i32, i32, i32
  }
  func.func @transform_12(%arg0: i32) -> (i32, i32, i32) {
    %c0_i32 = arith.constant 0 : i32
    %c0_i32_0 = arith.constant 0 : i32
    %c0_i32_1 = arith.constant 0 : i32
    return %arg0, %c0_i32, %c0_i32_0 : i32, i32, i32
  }
  func.func @transform_13(%arg0: i32) -> (i32, i32, i32) {
    %c0_i32 = arith.constant 0 : i32
    %c0_i32_0 = arith.constant 0 : i32
    %c0_i32_1 = arith.constant 0 : i32
    return %arg0, %c0_i32, %c0_i32_0 : i32, i32, i32
  }
  func.func @transform_14(%arg0: i32) -> (i32, i32, i32) {
    %c0_i32 = arith.constant 0 : i32
    %c0_i32_0 = arith.constant 0 : i32
    %c0_i32_1 = arith.constant 0 : i32
    return %arg0, %c0_i32, %c0_i32_0 : i32, i32, i32
  }
}

</mosaic_0001>

<bundles_post_ra>
// kernel: biencoder_forward.1
= control target key start
LH: loop header
LB: loop body
LE: loop exit
PB: predicated region body
PF: predicated region fallthrough
CT: control target
= control target key end

     0   :  { %s5048_s29 = smov 0   ;;  %s5551_s0 = inlined_call_operand.vmem [shape: f32[2,16,32], index: 0, kind: input, shape index: {}]   ;;  %s5552_s1 = inlined_call_operand.vmem [shape: f32[2,16,16], index: 1, kind: input, shape index: {}]   ;;  %s5553_s2 = inlined_call_operand.vmem [shape: f32[2,8,32,32], index: 2, kind: input, shape index: {}]   ;;  %s5554_s3 = inlined_call_operand.vmem [shape: f32[2,8,32], index: 3, kind: input, shape index: {}]   ;;  %s5555_s4 = inlined_call_operand.vmem [shape: f32[2,2,32,64], index: 4, kind: input, shape index: {}]   ;;  %s5556_s5 = inlined_call_operand.vmem [shape: f32[2,2,64], index: 5, kind: input, shape index: {}]   ;;  %s5557_s6 = inlined_call_operand.vmem [shape: f32[2,2,64,32], index: 6, kind: input, shape index: {}]   ;;  %s5558_s7 = inlined_call_operand.vmem [shape: f32[2,2,32], index: 7, kind: input, shape index: {}]   ;;  %s5559_s8 = inlined_call_operand.vmem [shape: f32[2,5,32], index: 8, kind: input, shape index: {}]   ;;  %s5560_s9 = inlined_call_operand.vmem [shape: f32[2,5,32], index: 9, kind: input, shape index: {}]   ;;  %s5561_s10 = inlined_call_operand.vmem [shape: f32[2,32,32], index: 10, kind: input, shape index: {}]   ;;  %s5562_s11 = inlined_call_operand.vmem [shape: f32[2,1,32], index: 11, kind: input, shape index: {}]   ;;  %s5563_s12 = inlined_call_operand.vmem [shape: f32[2,32,128], index: 12, kind: input, shape index: {}]   ;;  %s5564_s13 = inlined_call_operand.vmem [shape: f32[2,1,128], index: 13, kind: input, shape index: {}]   ;;  %s5565_s14 = inlined_call_operand.vmem [shape: f32[2,2,128], index: 14, kind: output, shape index: {}]  }
   0x1 LB: > { %s4029_s30 = sadd.s32 4294967295, %s4968_s29   ;;  %p4033_p0 = scmp.ge.s32.totalorder %s4968_s29, 1  ;;  %s4968_s29 = sphi %s5048_s29, %s24_s29  }
   0x2   : > { %p533_p1 = scmp.lt.s32.totalorder %s4968_s29, 3 }
   0x4   : > { %p534_p2 = pnand %p4033_p0, %p533_p1 }
   0x5   : > { %p634_p3 = scmp.lt.s32.totalorder (!%p534_p2), %s4029_s30, 1  ;;  %vm723_vm0 = vcmask (!%p534_p2), 261120   ;;  %v703_v48 = vlaneseq (!%p534_p2)  ;;  %v4970_v53 = vmov (!%p534_p2), 0.0   ;;  %vm1120_vm12 = vcmask (!%p534_p2), 130048  }
   0x6   : > { %537 = sbr.rel (%p534_p2) target bundleno = 7728 (0x1e30), region = 76  ;;  %vm5161_vm11 = vmpackc.low (!%p534_p2), %vm723_vm0, %vm723_vm0  ;;  %vm2046_vm13 = vcmask (!%p534_p2), 523264   ;;  %vm4972_vm14 = vmmov (!%p534_p2), 0  }
   0x7   : > { %v5120_v49 = vand.u32 (!%p534_p2), 127, %v703_v48 }
   0x9   : > { %vm709_vm1 = vcmp.ge.s32.totalorder (!%p534_p2), %v5120_v49, 8  ;;  %vm710_vm2 = vcmp.lt.s32.totalorder (!%p534_p2), %v5120_v49, 16  ;;  %vm713_vm3 = vcmp.ge.s32.totalorder (!%p534_p2), %v5120_v49, 16  ;;  %vm714_vm4 = vcmp.lt.s32.totalorder (!%p534_p2), %v5120_v49, 24 }
   0xa   : > { %vm717_vm5 = vcmp.ge.s32.totalorder (!%p534_p2), %v5120_v49, 24  ;;  %vm718_vm6 = vcmp.lt.s32.totalorder (!%p534_p2), %v5120_v49, 32  ;;  %vm711_vm7 = vmand (!%p534_p2), %vm709_vm1, %vm710_vm2  ;;  %vm706_vm8 = vcmp.lt.s32.totalorder (!%p534_p2), %v5120_v49, 8 }
   0xb   : > { %vm715_vm9 = vmand (!%p534_p2), %vm713_vm3, %vm714_vm4  ;;  %v5138_v54 = vsel (!%p534_p2), %vm706_vm8, 1.0, %v4970_v53  ;;  %v5141_v55 = vsel (!%p534_p2), %vm711_vm7, 1.0, %v4970_v53 }
   0xc   : > { %vm719_vm10 = vmand (!%p534_p2), %vm717_vm5, %vm718_vm6  ;;  %v5144_v56 = vsel (!%p534_p2), %vm715_vm9, 1.0, %v4970_v53 }
   0xd   : > { %s5569_s30 = smov (!%p634_p3, %s4029_s30), 1  ;;  %v5147_v58 = vsel %vm719_vm10, 1.0, %v4970_v53 }
   0xe   : > { %s4195_s15 = sshll.u32 %s5569_s30, 4  ;;  %s4197_s19 = sshll.u32 %s5569_s30, 8 }
   0xf   : > { %s638_s18 = scalar_lea.vmem %s5551_s0, %s4195_s15  ;;  %s5072_s22 = scalar_lea.vmem %s5553_s2, %s4197_s19 }
  0x10   : > { %v699_v0 = vld [vmem:[%s638_s18] sm:$0xff]  ;;  %v700_v2 = vld [vmem:[%s638_s18 + $0x8] sm:$0xff]  ;;  %v765_v19 = vld [vmem:[%s5072_s22 + $0x10] sm:$0xff]  ;;  %s5085_s23 = sshll.u32 %s5569_s30, 3  ;;  %s4199_s28 = sshll.u32 %s5569_s30, 7 }
  0x11   : > { %v724_v1 = vsel %vm723_vm0, %v699_v0, 0.0  ;;  %v727_v3 = vsel %vm723_vm0, %v700_v2, 0.0  ;;  %v763_v14 = vld [vmem:[%s5072_s22] sm:$0xff]  ;;  %v764_v15 = vld [vmem:[%s5072_s22 + $0x8] sm:$0xff]  ;;  %v766_v20 = vld [vmem:[%s5072_s22 + $0x18] sm:$0xff]  ;;  %s5091_s26 = scalar_lea.vmem %s5559_s8, %s5085_s23  ;;  %s5097_s16 = scalar_lea.vmem %s5560_s9, %s5085_s23 }
  0x12   : > { %725 = vadd.xlane.f32.xlu0 %v724_v1  ;;  %v4056_v16 = vld [vmem:[%s5072_s22 + $0x20] sm:$0xff]  ;;  %v4648_v17 = vpack.c.bf16 %v764_v15, %v763_v14  ;;  %v4057_v18 = vld [vmem:[%s5072_s22 + $0x28] sm:$0xff]  ;;  %v4652_v22 = vpack.c.bf16 %v766_v20, %v765_v19  ;;  %v4058_v23 = vld [vmem:[%s5072_s22 + $0x30] sm:$0xff]  ;;  %s5130_s19 = scalar_lea.vmem %s5554_s3, %s5085_s23  ;;  %s5203_s23 = scalar_lea.vmem %s5552_s1, %s4195_s15 }
  0x13   : > { %v4656_v21 = vpack.c.bf16 %v4057_v18, %v4056_v16  ;;  %v4059_v24 = vld [vmem:[%s5072_s22 + $0x38] sm:$0xff]  ;;  %v4060_v26 = vld [vmem:[%s5072_s22 + $0x40] sm:$0xff]  ;;  %v4061_v27 = vld [vmem:[%s5072_s22 + $0x48] sm:$0xff]  ;;  %s4198_s15 = sshll.u32 %s5569_s30, 6  ;;  %s5305_s20 = scalar_lea.vmem %s5557_s6, %s4199_s28 }
  0x14   : > { %4649 = vmatprep.subr.bf16.mxu0 %v4648_v17  ;;  %v4660_v25 = vpack.c.bf16 %v4059_v24, %v4058_v23  ;;  %v4664_v28 = vpack.c.bf16 %v4061_v27, %v4060_v26  ;;  %v4054_v36 = vld [vmem:[%s5091_s26] ss:$0 sm:$0xff]  ;;  %v4062_v43 = vld [vmem:[%s5072_s22 + $0x50] sm:$0xff]  ;;  %v4063_v44 = vld [vmem:[%s5072_s22 + $0x58] sm:$0xff]  ;;  %s5288_s27 = scalar_lea.vmem %s5555_s4, %s4198_s15  ;;  %s5316_s21 = sshll.u32 %s5569_s30, 1 }
  0x15   : > { %4651 = vmatpush3.bf16.msra.mxu0 %v4648_v17  ;;  %4657 = vmatprep.subr.bf16.mxu1 %v4656_v21  ;;  %v4055_v38 = vld [vmem:[%s5097_s16] ss:$0 sm:$0xff]  ;;  %v4668_v47 = vpack.c.bf16 %v4063_v44, %v4062_v43  ;;  %v4071_v50 = vld [vmem:[%s5130_s19 + $0x1] ss:$0 sm:$0xff]  ;;  %s5322_s25 = scalar_lea.vmem %s5556_s5, %s5316_s21  ;;  %s5331_s18 = scalar_lea.vmem %s5558_s7, %s5316_s21 }
  0x16   : > { %728 = vadd.xlane.f32.xlu0 %v727_v3  ;;  %4659 = vmatpush3.bf16.msra.mxu1 %v4656_v21  ;;  %v4068_v51 = vld [vmem:[%s5130_s19] ss:$0 sm:$0xff] }
  0x17   : > { %4653 = vmatprep.subr.bf16.mxu0 %v4652_v22  ;;  %4661 = vmatprep.subr.bf16.mxu1 %v4660_v25  ;;  %v5209_v23 = vld [vmem:[%s5203_s23] sm:$0xff] }
  0x19   : > { %4655 = vmatpush3.bf16.msra.mxu0 %v4652_v22  ;;  %v5206_v22 = vld [vmem:[%s5203_s23 + $0x8] sm:$0xff] }
  0x1a   : > { %4663 = vmatpush3.bf16.msra.mxu1 %v4660_v25  ;;  %4665 = vmatprep.subr.bf16.mxu0 %v4664_v28 }
  0x9f   : > { %v726_v4 = vpop.xlane.xlu0 %725 }
  0xa0   : > { %v731_v5 = vmul.f32 0.03125, %v726_v4 }
  0xa2   : > { %v733_v6 = vsub.f32 %v699_v0, %v731_v5 }
  0xa3   : > { %v729_v7 = vpop.xlane.xlu0 %728 }
  0xa4   : > { %v732_v8 = vmul.f32 0.03125, %v729_v7  ;;  %v735_v9 = vmul.f32 %v733_v6, %v733_v6 }
  0xa6   : > { %v734_v10 = vsub.f32 %v700_v2, %v732_v8  ;;  %v737_v11 = vsel %vm723_vm0, %v735_v9, 0.0  ;;  %v4961_v9 = vld [vmem:[%s5203_s23] sm:$0xff] }
  0xa7   : > { %738 = vadd.xlane.f32.xlu1 %v737_v11 }
  0xa8   : > { %v736_v12 = vmul.f32 %v734_v10, %v734_v10 }
  0xaa   : > { %v740_v13 = vsel %vm723_vm0, %v736_v12, 0.0 }
  0xab   : > { %741 = vadd.xlane.f32.xlu1 %v740_v13 }
 0x134   : > { %v739_v29 = vpop.xlane.xlu1 %738 }
 0x135   : > { %v743_v30 = vmul.f32 0.03125, %v739_v29 }
 0x137   : > { %v745_v31 = vadd.f32 1e-12, %v743_v30 }
 0x138   : > { %v742_v32 = vpop.xlane.xlu1 %741 }
 0x139   : > { %4866 = vrsqrt.f32 %v745_v31  ;;  %v744_v33 = vmul.f32 0.03125, %v742_v32 }
 0x13b   : > { %v746_v34 = vadd.f32 1e-12, %v744_v33 }
 0x13d   : > { %4868 = vrsqrt.f32 %v746_v34 }
 0x143   : > { %v4867_v35 = vpop.eup %4866 }
 0x144   : > { %v749_v37 = vmul.f32 %v4867_v35, %v733_v6 }
 0x146   : > { %v755_v39 = vmul.f32 %v4054_v36, %v749_v37 }
 0x147   : > { %v4869_v40 = vpop.eup %4868 }
 0x148   : > { %v5101_v41 = vadd.f32 %v4055_v38, %v755_v39  ;;  %v750_v42 = vmul.f32 %v4869_v40, %v734_v10  ;;  %v4074_v10 = vld [vmem:[%s5130_s19 + $0x2] ss:$0 sm:$0xff] }
 0x14a   : > { %4367 = vmatprep.mubr.msk.f32.mxu0 %vm723_vm0, %v5101_v41  ;;  %4378 = vmatprep.mubr.msk.f32.mxu1 %vm723_vm0, %v5101_v41  ;;  %v756_v45 = vmul.f32 %v4054_v36, %v750_v42 }
 0x14c   : > { %v5109_v46 = vadd.f32 %v4055_v38, %v756_v45 }
 0x14e   : > { %4368 = vmatmul.mubr.msk.f32.vlgmr.msra.gmra.mrb[0].mxu0 %vm723_vm0, %v5109_v46  ;;  %4379 = vmatmul.mubr.msk.f32.vlgmr.msra.gmra.mrb[0].mxu1 %vm723_vm0, %v5109_v46 }
 0x14f   : > { %4667 = vmatpush3.bf16.msra.mxu0 %v4664_v28  ;;  %4389 = vmatprep.mubr.msk.f32.mxu0 %vm723_vm0, %v5101_v41 }
 0x150   : > { %4669 = vmatprep.subr.bf16.mxu0 %v4668_v47 }
 0x153   : > { %4671 = vmatpush3.bf16.msra.mxu0 %v4668_v47 }
 0x156   : > { %4390 = vmatmul.mubr.msk.f32.vlgmr.msra.gmra.mrb[2].mxu0 %vm723_vm0, %v5109_v46 }
 0x221   : > { %v4369_v52 = vpop.f32.mrb[0].mxu0  ;;  %v4380_v57 = vpop.f32.mrb[0].mxu1 }
 0x222   : > { %v947_v59 = vadd.f32 %v4380_v57, %v4071_v50  ;;  %v862_v60 = vpop.f32.mrb[1].mxu0  ;;  %v941_v61 = vpop.f32.mrb[1].mxu1  ;;  %v868_v18 = vadd.f32 %v4369_v52, %v4068_v51 }
 0x223   : > { %v863_v62 = vadd.f32 %v4068_v51, %v862_v60  ;;  %v942_v63 = vadd.f32 %v4071_v50, %v941_v61 }
 0x224   : > { %v1032_v0 = vmul.f32 %v947_v59, %v5138_v54  ;;  %v1229_v1 = vmul.f32 %v947_v59, %v5141_v55  ;;  %v1419_v2 = vmul.f32 %v947_v59, %v5144_v56  ;;  %v1609_v3 = vmul.f32 %v947_v59, %v5147_v58 }
 0x225   : > { %v5153_v4 = vmul.f32 0.35355338, %v863_v62  ;;  %v1031_v5 = vmul.f32 %v942_v63, %v5138_v54  ;;  %v1228_v6 = vmul.f32 %v942_v63, %v5141_v55  ;;  %v1418_v7 = vmul.f32 %v942_v63, %v5144_v56 }
 0x226   : > { %v1608_v8 = vmul.f32 %v942_v63, %v5147_v58  ;;  %v5180_v21 = vmul.f32 0.35355338, %v868_v18 }
 0x227   : > { %4396 = vmatprep.mubr.msk.f32.mxu1 %vm723_vm0, %v5153_v4  ;;  %v4672_v11 = vpack.c.bf16 %v1032_v0, %v1031_v5  ;;  %v4682_v12 = vpack.c.bf16 %v1229_v1, %v1228_v6  ;;  %v5170_v14 = vpack.c.bf16 %v1419_v2, %v1418_v7 }
 0x228   : > { %v5168_v13 = vpack.c.bf16 %v1609_v3, %v1608_v8 }
 0x229   : > { %v4391_v15 = vpop.f32.mrb[2].mxu0  ;;  %4674 = vmatprep.subr.msk.bf16.mxu1 %vm5161_vm11, %v4672_v11 }
 0x22a   : > { %v1026_v16 = vadd.f32 %v4391_v15, %v4074_v10  ;;  %v1020_v17 = vpop.f32.mrb[3].mxu0  ;;  %4677 = vmatpush3.bf16.xpose.msk.msra.mxu1 %vm5161_vm11, %v4672_v11 }
 0x22b   : > { %v1021_v19 = vadd.f32 %v4074_v10, %v1020_v17  ;;  %4684 = vmatprep.subr.msk.bf16.mxu1 %vm5161_vm11, %v4682_v12 }
 0x22d   : > { %v5178_v20 = vpack.c.bf16 %v1026_v16, %v1021_v19 }
 0x22f   : > { %4679 = vmatprep.subr.bf16.mxu0 %v5178_v20 }
 0x230   : > { %4681 = vmatpush3.bf16.msra.mxu0 %v5178_v20 }
 0x231   : > { %4689 = vmatprep.subr.bf16.mxu0 %v5178_v20  ;;  %4397 = vmatmul.mubr.msk.f32.vlgmr.msra.gmra.mrb[2].mxu1 %vm723_vm0, %v5180_v21 }
 0x232   : > { %4687 = vmatpush3.bf16.xpose.msk.msra.mxu1 %vm5161_vm11, %v4682_v12  ;;  %4410 = vmatprep.mubr.msk.f32.mxu1 %vm723_vm0, %v5153_v4 }
 0x233   : > { %4699 = vmatprep.subr.bf16.mxu1 %v5178_v20 }
 0x239   : > { %4411 = vmatmul.mubr.msk.f32.vlgmr.msra.gmra.mrb[4].mxu1 %vm723_vm0, %v5180_v21 }
 0x23a   : > { %4701 = vmatpush3.bf16.msra.mxu1 %v5178_v20 }
 0x23b   : > { %4704 = vmatprep.subr.msk.bf16.mxu1 %vm5161_vm11, %v5168_v13 }
 0x304   : > { %v4398_v24 = vpop.f32.mrb[2].mxu1 }
 0x305   : > { %v1117_v25 = vadd.f32 %v4398_v24, %v5206_v22  ;;  %v1111_v26 = vpop.f32.mrb[3].mxu1 }
 0x306   : > { %v1112_v27 = vadd.f32 %v1111_v26, %v5209_v23 }
 0x307   : > { %v1124_v28 = vsel %vm1120_vm12, %v1117_v25, -inf }
 0x308   : > { %1125 = vmax.xlane.f32.xlu1 %v1124_v28  ;;  %v1121_v29 = vsel %vm1120_vm12, %v1112_v27, -inf }
 0x309   : > { %1122 = vmax.xlane.f32.xlu0 %v1121_v29 }
 0x30c   : > { %v4412_v30 = vpop.f32.mrb[4].mxu1 }
 0x30d   : > { %v1308_v31 = vadd.f32 %v4412_v30, %v5206_v22  ;;  %v1302_v32 = vpop.f32.mrb[5].mxu1 }
 0x30e   : > { %v1303_v33 = vadd.f32 %v1302_v32, %v5209_v23 }
 0x30f   : > { %v1314_v34 = vsel %vm1120_vm12, %v1308_v31, -inf }
 0x310   : > { %1315 = vmax.xlane.f32.xlu1 %v1314_v34  ;;  %v1311_v35 = vsel %vm1120_vm12, %v1303_v33, -inf }
 0x311   : > { %1312 = vmax.xlane.f32.xlu0 %v1311_v35 }
 0x395   : > { %v1126_v36 = vpop.xlane.xlu1 %1125 }
 0x396   : > { %v1128_v37 = vsub.f32 %v1117_v25, %v1126_v36  ;;  %v1123_v38 = vpop.xlane.xlu0 %1122 }
 0x397   : > { %v1127_v39 = vsub.f32 %v1112_v27, %v1123_v38 }
 0x398   : > { %v1131_v40 = vmul.f32 1.442695, %v1128_v37 }
 0x399   : > { %v1129_v42 = vmul.f32 1.442695, %v1127_v39 }
 0x39a   : > { %4870 = vpow2.f32 %v1131_v40 }
 0x39b   : > { %4872 = vpow2.f32 %v1129_v42 }
 0x39d   : > { %v1316_v43 = vpop.xlane.xlu1 %1315 }
 0x39e   : > { %v1318_v44 = vsub.f32 %v1308_v31, %v1316_v43  ;;  %v1313_v45 = vpop.xlane.xlu0 %1312 }
 0x39f   : > { %v1317_v47 = vsub.f32 %v1303_v33, %v1313_v45 }
 0x3a0   : > { %v1321_v50 = vmul.f32 1.442695, %v1318_v44 }
 0x3a1   : > { %v1319_v51 = vmul.f32 1.442695, %v1317_v47 }
 0x3a2   : > { %4874 = vpow2.f32 %v1321_v50 }
 0x3a3   : > { %4876 = vpow2.f32 %v1319_v51 }
 0x3a4   : > { %v4871_v52 = vpop.eup %4870 }
 0x3a5   : > { %v4873_v57 = vpop.eup %4872  ;;  %v1136_v59 = vsel %vm1120_vm12, %v4871_v52, 0.0 }
 0x3a6   : > { %1137 = vadd.xlane.f32.xlu1 %v1136_v59  ;;  %v1133_v60 = vsel %vm1120_vm12, %v4873_v57, 0.0 }
 0x3a7   : > { %1134 = vadd.xlane.f32.xlu0 %v1133_v60 }
 0x3ac   : > { %v4875_v61 = vpop.eup %4874 }
 0x3ad   : > { %v4877_v62 = vpop.eup %4876  ;;  %v1326_v63 = vsel %vm1120_vm12, %v4875_v61, 0.0 }
 0x3ae   : > { %1327 = vadd.xlane.f32.xlu1 %v1326_v63  ;;  %v1323_v0 = vsel %vm1120_vm12, %v4877_v62, 0.0 }
 0x3af   : > { %1324 = vadd.xlane.f32.xlu0 %v1323_v0 }
 0x433   : > { %v1138_v1 = vpop.xlane.xlu1 %1137 }
 0x434   : > { %4878 = vrcp.f32 %v1138_v1  ;;  %v1135_v2 = vpop.xlane.xlu0 %1134 }
 0x435   : > { %4880 = vrcp.f32 %v1135_v2 }
 0x43b   : > { %v1328_v3 = vpop.xlane.xlu1 %1327 }
 0x43c   : > { %4882 = vrcp.f32 %v1328_v3  ;;  %v1325_v5 = vpop.xlane.xlu0 %1324 }
 0x43d   : > { %4884 = vrcp.f32 %v1325_v5 }
 0x43e   : > { %v4879_v6 = vpop.eup %4878 }
 0x43f   : > { %v4881_v7 = vpop.eup %4880  ;;  %v1142_v10 = vmul.f32 %v4879_v6, %v4871_v52 }
 0x440   : > { %v1141_v8 = vmul.f32 %v4881_v7, %v4873_v57 }
 0x442   : > { %4403 = vmatprep.mubr.msk.f32.mxu0 %vm1120_vm12, %v1141_v8 }
 0x443   : > { %4404 = vmatmul.mubr.msk.f32.vlgmr.msra.gmra.mrb[4].mxu0 %vm1120_vm12, %v1142_v10 }
 0x444   : > { %4691 = vmatpush3.bf16.msra.mxu0 %v5178_v20 }
 0x445   : > { %4694 = vmatprep.subr.msk.bf16.mxu0 %vm5161_vm11, %v5170_v14 }
 0x446   : > { %v4883_v11 = vpop.eup %4882 }
 0x447   : > { %v4885_v12 = vpop.eup %4884  ;;  %v1332_v16 = vmul.f32 %v4883_v11, %v4875_v61 }
 0x448   : > { %v1331_v15 = vmul.f32 %v4885_v12, %v4877_v62 }
 0x44a   : > { %4417 = vmatprep.mubr.msk.f32.mxu0 %vm1120_vm12, %v1331_v15 }
 0x44b   : > { %4418 = vmatmul.mubr.msk.f32.vlgmr.msra.gmra.mrb[6].mxu0 %vm1120_vm12, %v1332_v16 }
 0x44c   : > { %4424 = vmatprep.mubr.msk.f32.mxu0 %vm723_vm0, %v5153_v4 }
 0x44d   : > { %4697 = vmatpush3.bf16.xpose.msk.msra.mxu0 %vm5161_vm11, %v5170_v14 }
 0x44e   : > { %4709 = vmatprep.subr.bf16.mxu0 %v5178_v20 }
 0x454   : > { %4425 = vmatmul.mubr.msk.f32.vlgmr.msra.gmra.mrb[8].mxu0 %vm723_vm0, %v5180_v21 }
 0x455   : > { %4711 = vmatpush3.bf16.msra.mxu0 %v5178_v20 }
 0x516   : > { %v4405_v17 = vpop.f32.mrb[4].mxu0 }
 0x517   : > { %v1215_v18 = vpop.f32.mrb[5].mxu0  ;;  %v1225_v24 = vmul.f32 %v4405_v17, %v5138_v54 }
 0x518   : > { %v1224_v27 = vmul.f32 %v1215_v18, %v5138_v54 }
 0x51e   : > { %v4419_v19 = vpop.f32.mrb[6].mxu0 }
 0x51f   : > { %v1415_v25 = vmul.f32 %v4419_v19, %v5141_v55  ;;  %v1405_v26 = vpop.f32.mrb[7].mxu0  ;;  %v4064_v19 = vld [vmem:[%s5072_s22 + $0x60] sm:$0xff] }
 0x520   : > { %v1414_v28 = vmul.f32 %v1405_v26, %v5141_v55 }
 0x521   : > { %v1417_v14 = vadd.f32 %v1415_v25, %v1225_v24  ;;  %v4065_v24 = vld [vmem:[%s5072_s22 + $0x68] sm:$0xff] }
 0x522   : > { %v1416_v29 = vadd.f32 %v1414_v28, %v1224_v27  ;;  %v4712_v25 = vpack.c.bf16 %v4065_v24, %v4064_v19  ;;  %v4105_v19 = vld [vmem:[%s5097_s16 + $0x1] ss:$0 sm:$0xff] }
 0x524   : > { %4713 = vmatprep.subr.bf16.mxu0 %v4712_v25 }
 0x527   : > { %v4426_v30 = vpop.f32.mrb[8].mxu0 }
 0x528   : > { %v1498_v31 = vadd.f32 %v4426_v30, %v5206_v22  ;;  %v1492_v32 = vpop.f32.mrb[9].mxu0 }
 0x529   : > { %v1493_v20 = vadd.f32 %v1492_v32, %v5209_v23  ;;  %v4067_v32 = vld [vmem:[%s5072_s22 + $0x78] sm:$0xff] }
 0x52a   : > { %v1504_v33 = vsel %vm1120_vm12, %v1498_v31, -inf }
 0x52b   : > { %1505 = vmax.xlane.f32.xlu1 %v1504_v33  ;;  %v1501_v34 = vsel %vm1120_vm12, %v1493_v20, -inf }
 0x52c   : > { %1502 = vmax.xlane.f32.xlu0 %v1501_v34 }
 0x5b8   : > { %v1506_v35 = vpop.xlane.xlu1 %1505 }
 0x5b9   : > { %v1508_v36 = vsub.f32 %v1498_v31, %v1506_v35  ;;  %v1503_v37 = vpop.xlane.xlu0 %1502  ;;  %v4066_v31 = vld [vmem:[%s5072_s22 + $0x70] sm:$0xff] }
 0x5ba   : > { %v1507_v38 = vsub.f32 %v1493_v20, %v1503_v37  ;;  %v4716_v20 = vpack.c.bf16 %v4067_v32, %v4066_v31  ;;  %v2036_v31 = vld [vmem:[%s5305_s20 + $0x18] sm:$0xff] }
 0x5bb   : > { %v1511_v39 = vmul.f32 1.442695, %v1508_v36 }
 0x5bc   : > { %v1509_v40 = vmul.f32 1.442695, %v1507_v38 }
 0x5bd   : > { %4886 = vpow2.f32 %v1511_v39  ;;  %v4101_v39 = vld [vmem:[%s5130_s19 + $0x3] ss:$0 sm:$0xff] }
 0x5be   : > { %4888 = vpow2.f32 %v1509_v40 }
 0x5c7   : > { %v4887_v42 = vpop.eup %4886 }
 0x5c8   : > { %v4889_v43 = vpop.eup %4888  ;;  %v1516_v44 = vsel %vm1120_vm12, %v4887_v42, 0.0 }
 0x5c9   : > { %1517 = vadd.xlane.f32.xlu1 %v1516_v44  ;;  %v1513_v45 = vsel %vm1120_vm12, %v4889_v43, 0.0 }
 0x5ca   : > { %1514 = vadd.xlane.f32.xlu0 %v1513_v45 }
 0x656   : > { %v1518_v47 = vpop.xlane.xlu1 %1517 }
 0x657   : > { %4890 = vrcp.f32 %v1518_v47  ;;  %v1515_v50 = vpop.xlane.xlu0 %1514 }
 0x658   : > { %4892 = vrcp.f32 %v1515_v50 }
 0x661   : > { %v4891_v51 = vpop.eup %4890 }
 0x662   : > { %v4893_v52 = vpop.eup %4892  ;;  %v1522_v59 = vmul.f32 %v4891_v51, %v4887_v42 }
 0x663   : > { %v1521_v57 = vmul.f32 %v4893_v52, %v4889_v43 }
 0x665   : > { %4431 = vmatprep.mubr.msk.f32.mxu1 %vm1120_vm12, %v1521_v57 }
 0x666   : > { %4432 = vmatmul.mubr.msk.f32.vlgmr.msra.gmra.mrb[6].mxu1 %vm1120_vm12, %v1522_v59 }
 0x667   : > { %4707 = vmatpush3.bf16.xpose.msk.msra.mxu1 %vm5161_vm11, %v5168_v13  ;;  %4438 = vmatprep.mubr.msk.f32.mxu1 %vm723_vm0, %v5153_v4 }
 0x66e   : > { %4439 = vmatmul.mubr.msk.f32.vlgmr.msra.gmra.mrb[8].mxu1 %vm723_vm0, %v5180_v21 }
 0x739   : > { %v4433_v60 = vpop.f32.mrb[6].mxu1 }
 0x73a   : > { %v1605_v61 = vmul.f32 %v4433_v60, %v5144_v56  ;;  %v1595_v62 = vpop.f32.mrb[7].mxu1 }
 0x73b   : > { %v1604_v63 = vmul.f32 %v1595_v62, %v5144_v56 }
 0x73c   : > { %v1607_v0 = vadd.f32 %v1605_v61, %v1417_v14 }
 0x73d   : > { %v1606_v1 = vadd.f32 %v1604_v63, %v1416_v29 }
 0x741   : > { %v4440_v2 = vpop.f32.mrb[8].mxu1 }
 0x742   : > { %v1688_v3 = vadd.f32 %v4440_v2, %v5206_v22  ;;  %v1682_v5 = vpop.f32.mrb[9].mxu1  ;;  %v1926_v2 = vld [vmem:[%s5288_s27 + $0x8] sm:$0xff] }
 0x743   : > { %v1683_v13 = vadd.f32 %v1682_v5, %v5209_v23  ;;  %v1927_v5 = vld [vmem:[%s5288_s27 + $0x10] sm:$0xff] }
 0x744   : > { %v1694_v6 = vsel %vm1120_vm12, %v1688_v3, -inf }
 0x745   : > { %1695 = vmax.xlane.f32.xlu1 %v1694_v6  ;;  %v1691_v4 = vsel %vm1120_vm12, %v1683_v13, -inf }
 0x746   : > { %1692 = vmax.xlane.f32.xlu0 %v1691_v4 }
 0x7d2   : > { %v1696_v21 = vpop.xlane.xlu1 %1695 }
 0x7d3   : > { %v1698_v7 = vsub.f32 %v1688_v3, %v1696_v21  ;;  %v1693_v8 = vpop.xlane.xlu0 %1692 }
 0x7d4   : > { %v1697_v10 = vsub.f32 %v1683_v13, %v1693_v8  ;;  %v1928_v13 = vld [vmem:[%s5288_s27 + $0x18] sm:$0xff] }
 0x7d5   : > { %v1701_v11 = vmul.f32 1.442695, %v1698_v7  ;;  %v4724_v6 = vpack.c.bf16 %v1928_v13, %v1927_v5  ;;  %v4109_v5 = vld [vmem:[%s5331_s18] ss:$0 sm:$0xff] }
 0x7d6   : > { %v1699_v12 = vmul.f32 1.442695, %v1697_v10 }
 0x7d7   : > { %4894 = vpow2.f32 %v1701_v11 }
 0x7d8   : > { %4896 = vpow2.f32 %v1699_v12 }
 0x7e1   : > { %v4895_v15 = vpop.eup %4894 }
 0x7e2   : > { %v4897_v16 = vpop.eup %4896  ;;  %v1706_v17 = vsel %vm1120_vm12, %v4895_v15, 0.0 }
 0x7e3   : > { %1707 = vadd.xlane.f32.xlu1 %v1706_v17  ;;  %v1703_v18 = vsel %vm1120_vm12, %v4897_v16, 0.0 }
 0x7e4   : > { %1704 = vadd.xlane.f32.xlu0 %v1703_v18 }
 0x870   : > { %v1708_v26 = vpop.xlane.xlu1 %1707 }
 0x871   : > { %4898 = vrcp.f32 %v1708_v26  ;;  %v1705_v27 = vpop.xlane.xlu0 %1704 }
 0x872   : > { %4900 = vrcp.f32 %v1705_v27 }
 0x87b   : > { %v4899_v28 = vpop.eup %4898 }
 0x87c   : > { %v4901_v14 = vpop.eup %4900  ;;  %v1712_v30 = vmul.f32 %v4899_v28, %v4895_v15  ;;  %v4104_v15 = vld [vmem:[%s5091_s26 + $0x1] ss:$0 sm:$0xff] }
 0x87d   : > { %v1711_v29 = vmul.f32 %v4901_v14, %v4897_v16  ;;  %v2033_v28 = vld [vmem:[%s5305_s20] sm:$0xff]  ;;  %v2034_v14 = vld [vmem:[%s5305_s20 + $0x8] sm:$0xff] }
 0x87f   : > { %4445 = vmatprep.mubr.msk.f32.mxu0 %vm1120_vm12, %v1711_v29  ;;  %v4728_v29 = vpack.c.bf16 %v2034_v14, %v2033_v28  ;;  %v4114_v28 = vld [vmem:[%s5072_s22 + $0x80] sm:$0xff]  ;;  %v4115_v14 = vld [vmem:[%s5072_s22 + $0x88] sm:$0xff] }
 0x880   : > { %4446 = vmatmul.mubr.msk.f32.vlgmr.msra.gmra.mrb[10].mxu0 %vm1120_vm12, %v1712_v30  ;;  %v2035_v30 = vld [vmem:[%s5305_s20 + $0x10] sm:$0xff] }
 0x881   : > { %4715 = vmatpush3.bf16.msra.mxu0 %v4712_v25  ;;  %v4732_v32 = vpack.c.bf16 %v2036_v31, %v2035_v30  ;;  %v4122_v30 = vld [vmem:[%s5072_s22 + $0xc0] sm:$0xff]  ;;  %v4123_v31 = vld [vmem:[%s5072_s22 + $0xc8] sm:$0xff] }
 0x882   : > { %4717 = vmatprep.subr.bf16.mxu0 %v4716_v20 }
 0x885   : > { %4719 = vmatpush3.bf16.msra.mxu0 %v4716_v20  ;;  %v2037_v20 = vld [vmem:[%s5305_s20 + $0x20] sm:$0xff] }
 0x886   : > { %4729 = vmatprep.subr.bf16.mxu0 %v4728_v29 }
 0x953   : > { %v4447_v33 = vpop.f32.mrb[10].mxu0 }
 0x954   : > { %v1795_v34 = vmul.f32 %v4447_v33, %v5147_v58  ;;  %v1785_v35 = vpop.f32.mrb[11].mxu0  ;;  %v2038_v33 = vld [vmem:[%s5305_s20 + $0x28] sm:$0xff] }
 0x955   : > { %v1794_v36 = vmul.f32 %v1785_v35, %v5147_v58  ;;  %v2039_v35 = vld [vmem:[%s5305_s20 + $0x30] sm:$0xff] }
 0x956   : > { %v1797_v37 = vadd.f32 %v1795_v34, %v1607_v0  ;;  %v4736_v34 = vpack.c.bf16 %v2038_v33, %v2037_v20  ;;  %v4116_v20 = vld [vmem:[%s5072_s22 + $0x90] sm:$0xff]  ;;  %v4117_v33 = vld [vmem:[%s5072_s22 + $0x98] sm:$0xff] }
 0x957   : > { %v1796_v38 = vadd.f32 %v1794_v36, %v1606_v1  ;;  %v2040_v36 = vld [vmem:[%s5305_s20 + $0x38] sm:$0xff] }
 0x959   : > { %4456 = vmatprep.mubr.msk.f32.mxu0 %vm723_vm0, %v1796_v38  ;;  %v4106_v38 = vld [vmem:[%s5322_s25] ss:$0 sm:$0xff] }
 0x95a   : > { %4457 = vmatmul.mubr.msk.f32.vlgmr.msra.gmra.mrb[12].mxu0 %vm723_vm0, %v1797_v37  ;;  %v4740_v37 = vpack.c.bf16 %v2040_v36, %v2039_v35  ;;  %v4748_v35 = vpack.c.bf16 %v4117_v33, %v4116_v20  ;;  %v4125_v36 = vld [vmem:[%s5072_s22 + $0xd8] sm:$0xff] }
 0x95b   : > { %4731 = vmatpush3.bf16.msra.mxu0 %v4728_v29  ;;  %v4744_v29 = vpack.c.bf16 %v4115_v14, %v4114_v28 }
 0x95c   : > { %4733 = vmatprep.subr.bf16.mxu0 %v4732_v32 }
 0x95f   : > { %4735 = vmatpush3.bf16.msra.mxu0 %v4732_v32  ;;  %v4760_v32 = vpack.c.bf16 %v4123_v31, %v4122_v30 }
 0x960   : > { %4737 = vmatprep.subr.bf16.mxu0 %v4736_v34 }
 0x963   : > { %4739 = vmatpush3.bf16.msra.mxu0 %v4736_v34  ;;  %v4124_v34 = vld [vmem:[%s5072_s22 + $0xd0] sm:$0xff] }
 0x964   : > { %4741 = vmatprep.subr.bf16.mxu0 %v4740_v37 }
 0x967   : > { %4743 = vmatpush3.bf16.msra.mxu0 %v4740_v37  ;;  %v4764_v37 = vpack.c.bf16 %v4125_v36, %v4124_v34 }
 0x968   : > { %4761 = vmatprep.subr.bf16.mxu0 %v4760_v32 }
 0xa2d   : > { %v4458_v40 = vpop.f32.mrb[12].mxu0 }
 0xa2e   : > { %v1880_v42 = vadd.f32 %v4458_v40, %v4101_v39  ;;  %v1874_v43 = vpop.f32.mrb[13].mxu0 }
 0xa2f   : > { %v1875_v44 = vadd.f32 %v4101_v39, %v1874_v43 }
 0xa30   : > { %v1884_v45 = vadd.f32 %v1880_v42, %v5109_v46  ;;  %v1925_v46 = vld [vmem:[%s5288_s27] sm:$0xff] }
 0xa31   : > { %v1883_v47 = vadd.f32 %v1875_v44, %v5101_v41  ;;  %v4720_v3 = vpack.c.bf16 %v1926_v2, %v1925_v46 }
 0xa32   : > { %v1890_v50 = vsel %vm723_vm0, %v1884_v45, 0.0 }
 0xa33   : > { %1891 = vadd.xlane.f32.xlu1 %v1890_v50  ;;  %v1887_v51 = vsel %vm723_vm0, %v1883_v47, 0.0  ;;  %4721 = vmatprep.subr.bf16.mxu1 %v4720_v3 }
 0xa34   : > { %1888 = vadd.xlane.f32.xlu0 %v1887_v51  ;;  %4723 = vmatpush3.bf16.msra.mxu1 %v4720_v3 }
 0xa35   : > { %4725 = vmatprep.subr.bf16.mxu1 %v4724_v6 }
 0xa38   : > { %4727 = vmatpush3.bf16.msra.mxu1 %v4724_v6 }
 0xa39   : > { %4745 = vmatprep.subr.bf16.mxu1 %v4744_v29 }
 0xac0   : > { %v1892_v52 = vpop.xlane.xlu1 %1891 }
 0xac1   : > { %v1894_v57 = vmul.f32 0.03125, %v1892_v52  ;;  %v1889_v59 = vpop.xlane.xlu0 %1888 }
 0xac2   : > { %v1893_v60 = vmul.f32 0.03125, %v1889_v59 }
 0xac3   : > { %v1896_v61 = vsub.f32 %v1884_v45, %v1894_v57 }
 0xac4   : > { %v1895_v62 = vsub.f32 %v1883_v47, %v1893_v60 }
 0xac5   : > { %v1898_v63 = vmul.f32 %v1896_v61, %v1896_v61 }
 0xac6   : > { %v1897_v0 = vmul.f32 %v1895_v62, %v1895_v62 }
 0xac7   : > { %v1902_v1 = vsel %vm723_vm0, %v1898_v63, 0.0 }
 0xac8   : > { %1903 = vadd.xlane.f32.xlu1 %v1902_v1  ;;  %v1899_v41 = vsel %vm723_vm0, %v1897_v0, 0.0 }
 0xac9   : > { %1900 = vadd.xlane.f32.xlu0 %v1899_v41 }
 0xb55   : > { %v1904_v4 = vpop.xlane.xlu1 %1903 }
 0xb56   : > { %v1906_v21 = vmul.f32 0.03125, %v1904_v4  ;;  %v1901_v7 = vpop.xlane.xlu0 %1900 }
 0xb57   : > { %v1905_v8 = vmul.f32 0.03125, %v1901_v7 }
 0xb58   : > { %v1908_v10 = vadd.f32 1e-12, %v1906_v21 }
 0xb59   : > { %v1907_v11 = vadd.f32 1e-12, %v1905_v8 }
 0xb5a   : > { %4902 = vrsqrt.f32 %v1908_v10 }
 0xb5b   : > { %4904 = vrsqrt.f32 %v1907_v11 }
 0xb64   : > { %v4903_v12 = vpop.eup %4902 }
 0xb65   : > { %v4905_v16 = vpop.eup %4904  ;;  %v1912_v17 = vmul.f32 %v4903_v12, %v1896_v61 }
 0xb66   : > { %v1911_v18 = vmul.f32 %v4905_v16, %v1895_v62 }
 0xb67   : > { %v1918_v24 = vmul.f32 %v4104_v15, %v1912_v17 }
 0xb68   : > { %v1917_v25 = vmul.f32 %v4104_v15, %v1911_v18 }
 0xb69   : > { %v1924_v27 = vadd.f32 %v4105_v19, %v1918_v24 }
 0xb6a   : > { %v5296_v26 = vadd.f32 %v4105_v19, %v1917_v25 }
 0xb6c   : > { %4467 = vmatprep.mubr.msk.f32.mxu1 %vm723_vm0, %v5296_v26 }
 0xb6d   : > { %4468 = vmatmul.mubr.msk.f32.vlgmr.msra.gmra.mrb[10].mxu1 %vm723_vm0, %v1924_v27 }
 0xb6e   : > { %4747 = vmatpush3.bf16.msra.mxu1 %v4744_v29 }
 0xb6f   : > { %4749 = vmatprep.subr.bf16.mxu1 %v4748_v35 }
 0xb72   : > { %4751 = vmatpush3.bf16.msra.mxu1 %v4748_v35 }
 0xc40   : > { %v4469_v39 = vpop.f32.mrb[10].mxu1 }
 0xc41   : > { %v2012_v40 = vadd.f32 %v4469_v39, %v4106_v38  ;;  %v2006_v42 = vpop.f32.mrb[11].mxu1  ;;  %v4119_v39 = vld [vmem:[%s5072_s22 + $0xa8] sm:$0xff] }
 0xc42   : > { %v2007_v43 = vadd.f32 %v4106_v38, %v2006_v42  ;;  %v4118_v38 = vld [vmem:[%s5072_s22 + $0xa0] sm:$0xff] }
 0xc43   : > { %v2016_v44 = vmul.f32 %v2012_v40, %v2012_v40 }
 0xc44   : > { %v2015_v45 = vmul.f32 %v2007_v43, %v2007_v43 }
 0xc45   : > { %v2018_v47 = vmul.f32 %v2016_v44, %v2012_v40 }
 0xc46   : > { %v2017_v50 = vmul.f32 %v2015_v45, %v2007_v43 }
 0xc47   : > { %v2020_v51 = vmul.f32 0.044715, %v2018_v47 }
 0xc48   : > { %v2019_v52 = vmul.f32 0.044715, %v2017_v50 }
 0xc49   : > { %v2022_v57 = vadd.f32 %v2020_v51, %v2012_v40 }
 0xc4a   : > { %v2021_v59 = vadd.f32 %v2019_v52, %v2007_v43  ;;  %v4112_v52 = vld [vmem:[%s5091_s26 + $0x2] ss:$0 sm:$0xff] }
 0xc4b   : > { %v2024_v60 = vmul.f32 0.7978846, %v2022_v57 }
 0xc4c   : > { %v2023_v61 = vmul.f32 0.7978846, %v2021_v59 }
 0xc4d   : > { %4906 = vtanh.f32 %v2024_v60 }
 0xc4e   : > { %4908 = vtanh.f32 %v2023_v61  ;;  %v4113_v61 = vld [vmem:[%s5097_s16 + $0x2] ss:$0 sm:$0xff] }
 0xc57   : > { %v4907_v62 = vpop.eup %4906 }
 0xc58   : > { %v4909_v63 = vpop.eup %4908  ;;  %v2028_v0 = vadd.f32 1.0, %v4907_v62 }
 0xc59   : > { %v2027_v1 = vadd.f32 1.0, %v4909_v63 }
 0xc5a   : > { %v2030_v41 = vmul.f32 0.5, %v2028_v0  ;;  %v4120_v0 = vld [vmem:[%s5072_s22 + $0xb0] sm:$0xff] }
 0xc5b   : > { %v2029_v46 = vmul.f32 0.5, %v2027_v1  ;;  %v4121_v1 = vld [vmem:[%s5072_s22 + $0xb8] sm:$0xff] }
 0xc5c   : > { %v2032_v3 = vmul.f32 %v2030_v41, %v2012_v40  ;;  %v4752_v40 = vpack.c.bf16 %v4119_v39, %v4118_v38 }
 0xc5d   : > { %v2031_v2 = vmul.f32 %v2029_v46, %v2007_v43 }
 0xc5e   : > { %4753 = vmatprep.subr.bf16.mxu1 %v4752_v40 }
 0xc5f   : > { %4486 = vmatprep.mubr.msk.f32.mxu0 %vm2046_vm13, %v2031_v2  ;;  %v4756_v2 = vpack.c.bf16 %v4121_v1, %v4120_v0 }
 0xc60   : > { %4487 = vmatmul.mubr.msk.f32.vlgmr.msra.gmra.mrb[14].mxu0 %vm2046_vm13, %v2032_v3  ;;  %v4136_v3 = vld [vmem:[%s5130_s19 + $0x6] ss:$0 sm:$0xff] }
 0xc61   : > { %4763 = vmatpush3.bf16.msra.mxu0 %v4760_v32 }
 0xc62   : > { %4765 = vmatprep.subr.bf16.mxu0 %v4764_v37 }
 0xc65   : > { %4767 = vmatpush3.bf16.msra.mxu0 %v4764_v37 }
 0xd33   : > { %v4488_v13 = vpop.f32.mrb[14].mxu0 }
 0xd34   : > { %v2125_v6 = vadd.f32 %v4488_v13, %v4109_v5  ;;  %v2119_v4 = vpop.f32.mrb[15].mxu0 }
 0xd35   : > { %v2120_v21 = vadd.f32 %v4109_v5, %v2119_v4  ;;  %v4130_v5 = vld [vmem:[%s5130_s19 + $0x4] ss:$0 sm:$0xff] }
 0xd36   : > { %v2129_v7 = vadd.f32 %v2125_v6, %v1924_v27 }
 0xd37   : > { %v2128_v8 = vadd.f32 %v2120_v21, %v5296_v26 }
 0xd38   : > { %v2135_v10 = vsel %vm723_vm0, %v2129_v7, 0.0 }
 0xd39   : > { %2136 = vadd.xlane.f32.xlu1 %v2135_v10  ;;  %v2132_v11 = vsel %vm723_vm0, %v2128_v8, 0.0 }
 0xd3a   : > { %2133 = vadd.xlane.f32.xlu0 %v2132_v11 }
 0xdc6   : > { %v2137_v12 = vpop.xlane.xlu1 %2136 }
 0xdc7   : > { %v2139_v15 = vmul.f32 0.03125, %v2137_v12  ;;  %v2134_v16 = vpop.xlane.xlu0 %2133 }
 0xdc8   : > { %v2138_v17 = vmul.f32 0.03125, %v2134_v16 }
 0xdc9   : > { %v2141_v18 = vsub.f32 %v2129_v7, %v2139_v15  ;;  %v4133_v15 = vld [vmem:[%s5130_s19 + $0x5] ss:$0 sm:$0xff] }
 0xdca   : > { %v2140_v19 = vsub.f32 %v2128_v8, %v2138_v17 }
 0xdcb   : > { %v2143_v24 = vmul.f32 %v2141_v18, %v2141_v18 }
 0xdcc   : > { %v2142_v25 = vmul.f32 %v2140_v19, %v2140_v19 }
 0xdcd   : > { %v2147_v26 = vsel %vm723_vm0, %v2143_v24, 0.0 }
 0xdce   : > { %2148 = vadd.xlane.f32.xlu1 %v2147_v26  ;;  %v2144_v27 = vsel %vm723_vm0, %v2142_v25, 0.0 }
 0xdcf   : > { %2145 = vadd.xlane.f32.xlu0 %v2144_v27 }
 0xe5b   : > { %v2149_v42 = vpop.xlane.xlu1 %2148 }
 0xe5c   : > { %v2151_v43 = vmul.f32 0.03125, %v2149_v42  ;;  %v2146_v44 = vpop.xlane.xlu0 %2145 }
 0xe5d   : > { %v2150_v45 = vmul.f32 0.03125, %v2146_v44 }
 0xe5e   : > { %v2153_v47 = vadd.f32 1e-12, %v2151_v43 }
 0xe5f   : > { %v2152_v50 = vadd.f32 1e-12, %v2150_v45 }
 0xe60   : > { %4910 = vrsqrt.f32 %v2153_v47 }
 0xe61   : > { %4912 = vrsqrt.f32 %v2152_v50 }
 0xe6a   : > { %v4911_v51 = vpop.eup %4910 }
 0xe6b   : > { %v4913_v57 = vpop.eup %4912  ;;  %v2157_v59 = vmul.f32 %v4911_v51, %v2141_v18 }
 0xe6c   : > { %v2156_v60 = vmul.f32 %v4913_v57, %v2140_v19 }
 0xe6d   : > { %v2163_v62 = vmul.f32 %v4112_v52, %v2157_v59 }
 0xe6e   : > { %v2162_v63 = vmul.f32 %v4112_v52, %v2156_v60 }
 0xe6f   : > { %v5355_v46 = vadd.f32 %v4113_v61, %v2163_v62 }
 0xe70   : > { %v5353_v41 = vadd.f32 %v4113_v61, %v2162_v63 }
 0xe72   : > { %4497 = vmatprep.mubr.msk.f32.mxu1 %vm723_vm0, %v5353_v41  ;;  %4519 = vmatprep.mubr.msk.f32.mxu0 %vm723_vm0, %v5353_v41 }
 0xe73   : > { %4498 = vmatmul.mubr.msk.f32.vlgmr.msra.gmra.mrb[12].mxu1 %vm723_vm0, %v5355_v46  ;;  %4520 = vmatmul.mubr.msk.f32.vlgmr.msra.gmra.mrb[16].mxu0 %vm723_vm0, %v5355_v46 }
 0xe74   : > { %4755 = vmatpush3.bf16.msra.mxu1 %v4752_v40  ;;  %4508 = vmatprep.mubr.msk.f32.mxu1 %vm723_vm0, %v5353_v41 }
 0xe75   : > { %4757 = vmatprep.subr.bf16.mxu1 %v4756_v2 }
 0xe78   : > { %4759 = vmatpush3.bf16.msra.mxu1 %v4756_v2 }
 0xe7b   : > { %4509 = vmatmul.mubr.msk.f32.vlgmr.msra.gmra.mrb[14].mxu1 %vm723_vm0, %v5355_v46 }
 0xf46   : > { %v4499_v13 = vpop.f32.mrb[12].mxu1  ;;  %v4521_v6 = vpop.f32.mrb[16].mxu0 }
 0xf47   : > { %v2434_v4 = vadd.f32 %v4521_v6, %v4136_v3  ;;  %v2270_v21 = vpop.f32.mrb[13].mxu1  ;;  %v2428_v7 = vpop.f32.mrb[17].mxu0  ;;  %v2276_v34 = vadd.f32 %v4499_v13, %v4130_v5 }
 0xf48   : > { %v2271_v8 = vadd.f32 %v4130_v5, %v2270_v21  ;;  %v2429_v10 = vadd.f32 %v4136_v3, %v2428_v7 }
 0xf49   : > { %v5399_v35 = vmul.f32 0.35355338, %v2276_v34 }
 0xf4a   : > { %v5371_v11 = vmul.f32 0.35355338, %v2271_v8  ;;  %v5373_v12 = vpack.c.bf16 %v2434_v4, %v2429_v10 }
 0xf4c   : > { %4526 = vmatprep.mubr.msk.f32.mxu1 %vm723_vm0, %v5371_v11  ;;  %4775 = vmatprep.subr.bf16.mxu0 %v5373_v12 }
 0xf4d   : > { %4777 = vmatpush3.bf16.msra.mxu0 %v5373_v12 }
 0xf4e   : > { %v4510_v16 = vpop.f32.mrb[14].mxu1  ;;  %4785 = vmatprep.subr.bf16.mxu0 %v5373_v12 }
 0xf4f   : > { %v2355_v17 = vadd.f32 %v4510_v16, %v4133_v15  ;;  %v2349_v18 = vpop.f32.mrb[15].mxu1 }
 0xf50   : > { %v2350_v19 = vadd.f32 %v4133_v15, %v2349_v18 }
 0xf51   : > { %v2440_v24 = vmul.f32 %v2355_v17, %v5138_v54  ;;  %v2636_v25 = vmul.f32 %v2355_v17, %v5141_v55  ;;  %v2826_v26 = vmul.f32 %v2355_v17, %v5144_v56  ;;  %v3016_v27 = vmul.f32 %v2355_v17, %v5147_v58 }
 0xf52   : > { %v2439_v28 = vmul.f32 %v2350_v19, %v5138_v54  ;;  %v2635_v14 = vmul.f32 %v2350_v19, %v5141_v55  ;;  %v2825_v29 = vmul.f32 %v2350_v19, %v5144_v56  ;;  %v3015_v30 = vmul.f32 %v2350_v19, %v5147_v58 }
 0xf54   : > { %v4768_v31 = vpack.c.bf16 %v2440_v24, %v2439_v28  ;;  %v4778_v32 = vpack.c.bf16 %v2636_v25, %v2635_v14  ;;  %v5389_v20 = vpack.c.bf16 %v3016_v27, %v3015_v30  ;;  %v5391_v33 = vpack.c.bf16 %v2826_v26, %v2825_v29 }
 0xf56   : > { %4770 = vmatprep.subr.msk.bf16.mxu1 %vm5161_vm11, %v4768_v31 }
 0xf57   : > { %4773 = vmatpush3.bf16.xpose.msk.msra.mxu1 %vm5161_vm11, %v4768_v31 }
 0xf58   : > { %4780 = vmatprep.subr.msk.bf16.mxu1 %vm5161_vm11, %v4778_v32 }
 0xf5e   : > { %4527 = vmatmul.mubr.msk.f32.vlgmr.msra.gmra.mrb[16].mxu1 %vm723_vm0, %v5399_v35 }
 0xf5f   : > { %4783 = vmatpush3.bf16.xpose.msk.msra.mxu1 %vm5161_vm11, %v4778_v32  ;;  %4540 = vmatprep.mubr.msk.f32.mxu1 %vm723_vm0, %v5371_v11 }
 0xf60   : > { %4795 = vmatprep.subr.bf16.mxu1 %v5373_v12 }
 0xf66   : > { %4541 = vmatmul.mubr.msk.f32.vlgmr.msra.gmra.mrb[18].mxu1 %vm723_vm0, %v5399_v35 }
 0xf67   : > { %4797 = vmatpush3.bf16.msra.mxu1 %v5373_v12 }
 0xf68   : > { %4800 = vmatprep.subr.msk.bf16.mxu1 %vm5161_vm11, %v5389_v20 }
0x1031   : > { %v4528_v36 = vpop.f32.mrb[16].mxu1 }
0x1032   : > { %v2525_v37 = vadd.f32 %v4528_v36, %v5206_v22  ;;  %v2519_v38 = vpop.f32.mrb[17].mxu1 }
0x1033   : > { %v2520_v39 = vadd.f32 %v2519_v38, %v5209_v23 }
0x1034   : > { %v2531_v40 = vsel %vm1120_vm12, %v2525_v37, -inf }
0x1035   : > { %2532 = vmax.xlane.f32.xlu1 %v2531_v40  ;;  %v2528_v42 = vsel %vm1120_vm12, %v2520_v39, -inf }
0x1036   : > { %2529 = vmax.xlane.f32.xlu0 %v2528_v42 }
0x1039   : > { %v4542_v43 = vpop.f32.mrb[18].mxu1 }
0x103a   : > { %v2715_v44 = vadd.f32 %v4542_v43, %v5206_v22  ;;  %v2709_v45 = vpop.f32.mrb[19].mxu1 }
0x103b   : > { %v2710_v47 = vadd.f32 %v2709_v45, %v5209_v23 }
0x103c   : > { %v2721_v50 = vsel %vm1120_vm12, %v2715_v44, -inf }
0x103d   : > { %2722 = vmax.xlane.f32.xlu1 %v2721_v50  ;;  %v2718_v51 = vsel %vm1120_vm12, %v2710_v47, -inf }
0x103e   : > { %2719 = vmax.xlane.f32.xlu0 %v2718_v51 }
0x10c2   : > { %v2533_v52 = vpop.xlane.xlu1 %2532 }
0x10c3   : > { %v2535_v57 = vsub.f32 %v2525_v37, %v2533_v52  ;;  %v2530_v59 = vpop.xlane.xlu0 %2529 }
0x10c4   : > { %v2534_v60 = vsub.f32 %v2520_v39, %v2530_v59 }
0x10c5   : > { %v2538_v61 = vmul.f32 1.442695, %v2535_v57 }
0x10c6   : > { %v2536_v62 = vmul.f32 1.442695, %v2534_v60 }
0x10c7   : > { %4914 = vpow2.f32 %v2538_v61 }
0x10c8   : > { %4916 = vpow2.f32 %v2536_v62 }
0x10ca   : > { %v2723_v63 = vpop.xlane.xlu1 %2722 }
0x10cb   : > { %v2725_v0 = vsub.f32 %v2715_v44, %v2723_v63  ;;  %v2720_v1 = vpop.xlane.xlu0 %2719 }
0x10cc   : > { %v2724_v2 = vsub.f32 %v2710_v47, %v2720_v1 }
0x10cd   : > { %v2728_v3 = vmul.f32 1.442695, %v2725_v0 }
0x10ce   : > { %v2726_v5 = vmul.f32 1.442695, %v2724_v2 }
0x10cf   : > { %4918 = vpow2.f32 %v2728_v3 }
0x10d0   : > { %4920 = vpow2.f32 %v2726_v5 }
0x10d1   : > { %v4915_v13 = vpop.eup %4914 }
0x10d2   : > { %v4917_v6 = vpop.eup %4916  ;;  %v2543_v4 = vsel %vm1120_vm12, %v4915_v13, 0.0 }
0x10d3   : > { %2544 = vadd.xlane.f32.xlu1 %v2543_v4  ;;  %v2540_v21 = vsel %vm1120_vm12, %v4917_v6, 0.0 }
0x10d4   : > { %2541 = vadd.xlane.f32.xlu0 %v2540_v21 }
0x10d9   : > { %v4919_v7 = vpop.eup %4918 }
0x10da   : > { %v4921_v8 = vpop.eup %4920  ;;  %v2733_v10 = vsel %vm1120_vm12, %v4919_v7, 0.0 }
0x10db   : > { %2734 = vadd.xlane.f32.xlu1 %v2733_v10  ;;  %v2730_v15 = vsel %vm1120_vm12, %v4921_v8, 0.0  ;;  %v4960_v10 = vld [vmem:[%s5203_s23 + $0x8] sm:$0xff]  ;;  %s698_s23 = scalar_lea.vmem %s5565_s14, %s5316_s21 }
0x10dc   : > { %2731 = vadd.xlane.f32.xlu0 %v2730_v15 }
0x1160   : > { %v2545_v16 = vpop.xlane.xlu1 %2544 }
0x1161   : > { %4922 = vrcp.f32 %v2545_v16  ;;  %v2542_v17 = vpop.xlane.xlu0 %2541 }
0x1162   : > { %4924 = vrcp.f32 %v2542_v17 }
0x1168   : > { %v2735_v18 = vpop.xlane.xlu1 %2734 }
0x1169   : > { %4926 = vrcp.f32 %v2735_v18  ;;  %v2732_v19 = vpop.xlane.xlu0 %2731 }
0x116a   : > { %4928 = vrcp.f32 %v2732_v19 }
0x116b   : > { %v4923_v24 = vpop.eup %4922 }
0x116c   : > { %v4925_v25 = vpop.eup %4924  ;;  %v2549_v27 = vmul.f32 %v4923_v24, %v4915_v13 }
0x116d   : > { %v2548_v26 = vmul.f32 %v4925_v25, %v4917_v6 }
0x116f   : > { %4533 = vmatprep.mubr.msk.f32.mxu0 %vm1120_vm12, %v2548_v26 }
0x1170   : > { %4534 = vmatmul.mubr.msk.f32.vlgmr.msra.gmra.mrb[18].mxu0 %vm1120_vm12, %v2549_v27 }
0x1171   : > { %4787 = vmatpush3.bf16.msra.mxu0 %v5373_v12 }
0x1172   : > { %4790 = vmatprep.subr.msk.bf16.mxu0 %vm5161_vm11, %v5391_v33 }
0x1173   : > { %v4927_v28 = vpop.eup %4926 }
0x1174   : > { %v4929_v14 = vpop.eup %4928  ;;  %v2739_v30 = vmul.f32 %v4927_v28, %v4919_v7 }
0x1175   : > { %v2738_v29 = vmul.f32 %v4929_v14, %v4921_v8 }
0x1177   : > { %4547 = vmatprep.mubr.msk.f32.mxu0 %vm1120_vm12, %v2738_v29  ;;  %v4126_v29 = vld [vmem:[%s5072_s22 + $0xe0] sm:$0xff] }
0x1178   : > { %4548 = vmatmul.mubr.msk.f32.vlgmr.msra.gmra.mrb[20].mxu0 %vm1120_vm12, %v2739_v30  ;;  %v4127_v30 = vld [vmem:[%s5072_s22 + $0xe8] sm:$0xff] }
0x1179   : > { %4554 = vmatprep.mubr.msk.f32.mxu0 %vm723_vm0, %v5371_v11 }
0x117a   : > { %4793 = vmatpush3.bf16.xpose.msk.msra.mxu0 %vm5161_vm11, %v5391_v33 }
0x117b   : > { %4805 = vmatprep.subr.bf16.mxu0 %v5373_v12 }
0x1181   : > { %4555 = vmatmul.mubr.msk.f32.vlgmr.msra.gmra.mrb[22].mxu0 %vm723_vm0, %v5399_v35 }
0x1182   : > { %4807 = vmatpush3.bf16.msra.mxu0 %v5373_v12 }
0x1243   : > { %v4535_v31 = vpop.f32.mrb[18].mxu0 }
0x1244   : > { %v2622_v32 = vpop.f32.mrb[19].mxu0  ;;  %v2632_v36 = vmul.f32 %v4535_v31, %v5138_v54  ;;  %v4808_v31 = vpack.c.bf16 %v4127_v30, %v4126_v29  ;;  %v4177_v30 = vld [vmem:[%s5305_s20 + $0x50] sm:$0xff] }
0x1245   : > { %v2631_v39 = vmul.f32 %v2622_v32, %v5138_v54 }
0x1246   : > { %4809 = vmatprep.subr.bf16.mxu0 %v4808_v31 }
0x124b   : > { %v4549_v34 = vpop.f32.mrb[20].mxu0 }
0x124c   : > { %v2822_v37 = vmul.f32 %v4549_v34, %v5141_v55  ;;  %v2812_v38 = vpop.f32.mrb[21].mxu0 }
0x124d   : > { %v2821_v40 = vmul.f32 %v2812_v38, %v5141_v55 }
0x124e   : > { %v2824_v33 = vadd.f32 %v2822_v37, %v2632_v36 }
0x124f   : > { %v2823_v42 = vadd.f32 %v2821_v40, %v2631_v39  ;;  %v4128_v40 = vld [vmem:[%s5072_s22 + $0xf0] sm:$0xff] }
0x1254   : > { %v4556_v43 = vpop.f32.mrb[22].mxu0 }
0x1255   : > { %v2905_v44 = vadd.f32 %v4556_v43, %v5206_v22  ;;  %v2899_v45 = vpop.f32.mrb[23].mxu0 }
0x1256   : > { %v2900_v12 = vadd.f32 %v2899_v45, %v5209_v23 }
0x1257   : > { %v2911_v47 = vsel %vm1120_vm12, %v2905_v44, -inf }
0x1258   : > { %2912 = vmax.xlane.f32.xlu1 %v2911_v47  ;;  %v2908_v50 = vsel %vm1120_vm12, %v2900_v12, -inf }
0x1259   : > { %2909 = vmax.xlane.f32.xlu0 %v2908_v50 }
0x12e5   : > { %v2913_v51 = vpop.xlane.xlu1 %2912 }
0x12e6   : > { %v2915_v52 = vsub.f32 %v2905_v44, %v2913_v51  ;;  %v2910_v57 = vpop.xlane.xlu0 %2909  ;;  %v4163_v51 = vld [vmem:[%s5130_s19 + $0x7] ss:$0 sm:$0xff] }
0x12e7   : > { %v2914_v54 = vsub.f32 %v2900_v12, %v2910_v57 }
0x12e8   : > { %v2918_v59 = vmul.f32 1.442695, %v2915_v52 }
0x12e9   : > { %v2916_v55 = vmul.f32 1.442695, %v2914_v54 }
0x12ea   : > { %4930 = vpow2.f32 %v2918_v59 }
0x12eb   : > { %4932 = vpow2.f32 %v2916_v55 }
0x12f4   : > { %v4931_v60 = vpop.eup %4930 }
0x12f5   : > { %v4933_v61 = vpop.eup %4932  ;;  %v2923_v22 = vsel %vm1120_vm12, %v4931_v60, 0.0 }
0x12f6   : > { %2924 = vadd.xlane.f32.xlu1 %v2923_v22  ;;  %v2920_v23 = vsel %vm1120_vm12, %v4933_v61, 0.0 }
0x12f7   : > { %2921 = vadd.xlane.f32.xlu0 %v2920_v23 }
0x1383   : > { %v2925_v62 = vpop.xlane.xlu1 %2924 }
0x1384   : > { %4934 = vrcp.f32 %v2925_v62  ;;  %v2922_v63 = vpop.xlane.xlu0 %2921 }
0x1385   : > { %4936 = vrcp.f32 %v2922_v63 }
0x138e   : > { %v4935_v0 = vpop.eup %4934 }
0x138f   : > { %v4937_v1 = vpop.eup %4936  ;;  %v2929_v3 = vmul.f32 %v4935_v0, %v4931_v60 }
0x1390   : > { %v2928_v2 = vmul.f32 %v4937_v1, %v4933_v61 }
0x1392   : > { %4561 = vmatprep.mubr.msk.f32.mxu1 %vm1120_vm12, %v2928_v2 }
0x1393   : > { %4562 = vmatmul.mubr.msk.f32.vlgmr.msra.gmra.mrb[20].mxu1 %vm1120_vm12, %v2929_v3 }
0x1394   : > { %4803 = vmatpush3.bf16.xpose.msk.msra.mxu1 %vm5161_vm11, %v5389_v20  ;;  %4568 = vmatprep.mubr.msk.f32.mxu1 %vm723_vm0, %v5371_v11 }
0x139b   : > { %4569 = vmatmul.mubr.msk.f32.vlgmr.msra.gmra.mrb[22].mxu1 %vm723_vm0, %v5399_v35 }
0x1466   : > { %v4563_v5 = vpop.f32.mrb[20].mxu1 }
0x1467   : > { %v3012_v13 = vmul.f32 %v4563_v5, %v5144_v56  ;;  %v3002_v6 = vpop.f32.mrb[21].mxu1  ;;  %v4168_v5 = vld [vmem:[%s5288_s27 + $0x20] sm:$0xff] }
0x1468   : > { %v3011_v4 = vmul.f32 %v3002_v6, %v5144_v56 }
0x1469   : > { %v3014_v21 = vadd.f32 %v3012_v13, %v2824_v33  ;;  %v4129_v33 = vld [vmem:[%s5072_s22 + $0xf8] sm:$0xff]  ;;  %v4169_v13 = vld [vmem:[%s5288_s27 + $0x28] sm:$0xff]  ;;  %s4200_s22 = sshll.u32 %s5569_s30, 5 }
0x146a   : > { %v3013_v7 = vadd.f32 %v3011_v4, %v2823_v42  ;;  %v4812_v42 = vpack.c.bf16 %v4129_v33, %v4128_v40  ;;  %v4816_v6 = vpack.c.bf16 %v4169_v13, %v4168_v5  ;;  %v4170_v4 = vld [vmem:[%s5288_s27 + $0x30] sm:$0xff]  ;;  %v4172_v33 = vld [vmem:[%s5322_s25 + $0x1] ss:$0 sm:$0xff]  ;;  %s686_s25 = scalar_lea.vmem %s5562_s11, %s5569_s30 }
0x146c   : > { %4817 = vmatprep.subr.bf16.mxu1 %v4816_v6 }
0x146d   : > { %4819 = vmatpush3.bf16.msra.mxu1 %v4816_v6 }
0x146e   : > { %v4570_v8 = vpop.f32.mrb[22].mxu1 }
0x146f   : > { %v3095_v15 = vadd.f32 %v4960_v10, %v4570_v8  ;;  %v3089_v16 = vpop.f32.mrb[23].mxu1 }
0x1470   : > { %v3090_v20 = vadd.f32 %v4961_v9, %v3089_v16 }
0x1471   : > { %v3101_v17 = vsel %vm1120_vm12, %v3095_v15, -inf }
0x1472   : > { %3102 = vmax.xlane.f32.xlu1 %v3101_v17  ;;  %v3098_v11 = vsel %vm1120_vm12, %v3090_v20, -inf }
0x1473   : > { %3099 = vmax.xlane.f32.xlu0 %v3098_v11  ;;  %v4166_v11 = vld [vmem:[%s5091_s26 + $0x3] ss:$0 sm:$0xff] }
0x14ff   : > { %v3103_v35 = vpop.xlane.xlu1 %3102 }
0x1500   : > { %v3105_v18 = vsub.f32 %v3095_v15, %v3103_v35  ;;  %v3100_v19 = vpop.xlane.xlu0 %3099 }
0x1501   : > { %v3104_v56 = vsub.f32 %v3090_v20, %v3100_v19 }
0x1502   : > { %v3108_v24 = vmul.f32 1.442695, %v3105_v18 }
0x1503   : > { %v3106_v25 = vmul.f32 1.442695, %v3104_v56  ;;  %v4167_v56 = vld [vmem:[%s5097_s16 + $0x3] ss:$0 sm:$0xff] }
0x1504   : > { %4938 = vpow2.f32 %v3108_v24 }
0x1505   : > { %4940 = vpow2.f32 %v3106_v25 }
0x150e   : > { %v4939_v26 = vpop.eup %4938 }
0x150f   : > { %v4941_v27 = vpop.eup %4940  ;;  %v3113_v28 = vsel %vm1120_vm12, %v4939_v26, 0.0 }
0x1510   : > { %3114 = vadd.xlane.f32.xlu1 %v3113_v28  ;;  %v3110_v14 = vsel %vm1120_vm12, %v4941_v27, 0.0  ;;  %v4175_v28 = vld [vmem:[%s5305_s20 + $0x40] sm:$0xff] }
0x1511   : > { %3111 = vadd.xlane.f32.xlu0 %v3110_v14  ;;  %v4176_v14 = vld [vmem:[%s5305_s20 + $0x48] sm:$0xff] }
0x1512   : > { %v4824_v29 = vpack.c.bf16 %v4176_v14, %v4175_v28  ;;  %v3579_v28 = vshrl.u32 %v703_v48, 7 }
0x159d   : > { %v3115_v32 = vpop.xlane.xlu1 %3114 }
0x159e   : > { %4942 = vrcp.f32 %v3115_v32  ;;  %v3112_v34 = vpop.xlane.xlu0 %3111 }
0x159f   : > { %4944 = vrcp.f32 %v3112_v34  ;;  %v4179_v34 = vld [vmem:[%s5305_s20 + $0x60] sm:$0xff] }
0x15a8   : > { %v4943_v36 = vpop.eup %4942 }
0x15a9   : > { %v4945_v37 = vpop.eup %4944  ;;  %v3119_v39 = vmul.f32 %v4943_v36, %v4939_v26  ;;  %v4180_v36 = vld [vmem:[%s5305_s20 + $0x68] sm:$0xff] }
0x15aa   : > { %v3118_v38 = vmul.f32 %v4945_v37, %v4941_v27  ;;  %v4832_v37 = vpack.c.bf16 %v4180_v36, %v4179_v34  ;;  %v4187_v34 = vld [vmem:[%s5097_s16 + $0x4] ss:$0 sm:$0xff] }
0x15ac   : > { %4575 = vmatprep.mubr.msk.f32.mxu0 %vm1120_vm12, %v3118_v38  ;;  %v4181_v38 = vld [vmem:[%s5305_s20 + $0x70] sm:$0xff] }
0x15ad   : > { %4576 = vmatmul.mubr.msk.f32.vlgmr.msra.gmra.mrb[24].mxu0 %vm1120_vm12, %v3119_v39  ;;  %v4182_v39 = vld [vmem:[%s5305_s20 + $0x78] sm:$0xff] }
0x15ae   : > { %4811 = vmatpush3.bf16.msra.mxu0 %v4808_v31  ;;  %v4178_v31 = vld [vmem:[%s5305_s20 + $0x58] sm:$0xff]  ;;  %v4836_v40 = vpack.c.bf16 %v4182_v39, %v4181_v38  ;;  %s691_s20 = scalar_lea.vmem %s5563_s12, %s4200_s22 }
0x15af   : > { %4813 = vmatprep.subr.bf16.mxu0 %v4812_v42  ;;  %v4828_v32 = vpack.c.bf16 %v4178_v31, %v4177_v30 }
0x15b2   : > { %4815 = vmatpush3.bf16.msra.mxu0 %v4812_v42 }
0x15b3   : > { %4825 = vmatprep.subr.bf16.mxu0 %v4824_v29 }
0x1680   : > { %v4577_v43 = vpop.f32.mrb[24].mxu0 }
0x1681   : > { %v3202_v44 = vmul.f32 %v4577_v43, %v5147_v58  ;;  %v3192_v45 = vpop.f32.mrb[25].mxu0 }
0x1682   : > { %v3201_v12 = vmul.f32 %v3192_v45, %v5147_v58 }
0x1683   : > { %v3204_v47 = vadd.f32 %v3202_v44, %v3014_v21  ;;  %v4171_v21 = vld [vmem:[%s5288_s27 + $0x38] sm:$0xff]  ;;  %s683_s27 = scalar_lea.vmem %s5561_s10, %s4200_s22 }
0x1684   : > { %v3203_v50 = vadd.f32 %v3201_v12, %v3013_v7  ;;  %v4820_v7 = vpack.c.bf16 %v4171_v21, %v4170_v4  ;;  %v3656_v48 = vld [vmem:[%s683_s27] sm:$0xff] }
0x1686   : > { %4586 = vmatprep.mubr.msk.f32.mxu0 %vm723_vm0, %v3203_v50  ;;  %4821 = vmatprep.subr.bf16.mxu1 %v4820_v7 }
0x1687   : > { %4587 = vmatmul.mubr.msk.f32.vlgmr.msra.gmra.mrb[26].mxu0 %vm723_vm0, %v3204_v47  ;;  %4823 = vmatpush3.bf16.msra.mxu1 %v4820_v7 }
0x1688   : > { %4827 = vmatpush3.bf16.msra.mxu0 %v4824_v29  ;;  %v4186_v29 = vld [vmem:[%s5091_s26 + $0x4] ss:$0 sm:$0xff] }
0x1689   : > { %4829 = vmatprep.subr.bf16.mxu0 %v4828_v32 }
0x168c   : > { %4831 = vmatpush3.bf16.msra.mxu0 %v4828_v32 }
0x168d   : > { %4833 = vmatprep.subr.bf16.mxu0 %v4832_v37 }
0x1690   : > { %4835 = vmatpush3.bf16.msra.mxu0 %v4832_v37  ;;  %v3580_v37 = vmul.u32 8, %v3579_v28 }
0x1691   : > { %4837 = vmatprep.subr.bf16.mxu0 %v4836_v40 }
0x1692   : > { %vm3581_vm15 = vcmp.eq.s32.totalorder %v5120_v49, %v3580_v37 }
0x1694   : > { %4839 = vmatpush3.bf16.msra.mxu0 %v4836_v40 }
0x175a   : > { %v4588_v52 = vpop.f32.mrb[26].mxu0 }
0x175b   : > { %v3287_v57 = vadd.f32 %v4588_v52, %v4163_v51  ;;  %v3281_v54 = vpop.f32.mrb[27].mxu0 }
0x175c   : > { %v3282_v59 = vadd.f32 %v4163_v51, %v3281_v54 }
0x175d   : > { %v3291_v55 = vadd.f32 %v3287_v57, %v5355_v46 }
0x175e   : > { %v3290_v60 = vadd.f32 %v3282_v59, %v5353_v41 }
0x175f   : > { %v3297_v61 = vsel %vm723_vm0, %v3291_v55, 0.0 }
0x1760   : > { %3298 = vadd.xlane.f32.xlu1 %v3297_v61  ;;  %v3294_v58 = vsel %vm723_vm0, %v3290_v60, 0.0 }
0x1761   : > { %3295 = vadd.xlane.f32.xlu0 %v3294_v58 }
0x17ed   : > { %v3299_v22 = vpop.xlane.xlu1 %3298 }
0x17ee   : > { %v3301_v23 = vmul.f32 0.03125, %v3299_v22  ;;  %v3296_v62 = vpop.xlane.xlu0 %3295 }
0x17ef   : > { %v3300_v63 = vmul.f32 0.03125, %v3296_v62 }
0x17f0   : > { %v3303_v0 = vsub.f32 %v3291_v55, %v3301_v23 }
0x17f1   : > { %v3302_v1 = vsub.f32 %v3290_v60, %v3300_v63 }
0x17f2   : > { %v3305_v2 = vmul.f32 %v3303_v0, %v3303_v0 }
0x17f3   : > { %v3304_v46 = vmul.f32 %v3302_v1, %v3302_v1 }
0x17f4   : > { %v3309_v41 = vsel %vm723_vm0, %v3305_v2, 0.0  ;;  %v4183_v2 = vld [vmem:[%s5331_s18 + $0x1] ss:$0 sm:$0xff]  ;;  %s694_s18 = scalar_lea.vmem %s5564_s13, %s5569_s30 }
0x17f5   : > { %3310 = vadd.xlane.f32.xlu1 %v3309_v41  ;;  %v3306_v3 = vsel %vm723_vm0, %v3304_v46, 0.0 }
0x17f6   : > { %3307 = vadd.xlane.f32.xlu0 %v3306_v3 }
0x1882   : > { %v3311_v8 = vpop.xlane.xlu1 %3310 }
0x1883   : > { %v3313_v10 = vmul.f32 0.03125, %v3311_v8  ;;  %v3308_v15 = vpop.xlane.xlu0 %3307 }
0x1884   : > { %v3312_v16 = vmul.f32 0.03125, %v3308_v15 }
0x1885   : > { %v3315_v9 = vadd.f32 1e-12, %v3313_v10 }
0x1886   : > { %v3314_v20 = vadd.f32 1e-12, %v3312_v16 }
0x1887   : > { %4946 = vrsqrt.f32 %v3315_v9 }
0x1888   : > { %4948 = vrsqrt.f32 %v3314_v20 }
0x1891   : > { %v4947_v17 = vpop.eup %4946 }
0x1892   : > { %v4949_v35 = vpop.eup %4948  ;;  %v3319_v18 = vmul.f32 %v4947_v17, %v3303_v0 }
0x1893   : > { %v3318_v19 = vmul.f32 %v4949_v35, %v3302_v1 }
0x1894   : > { %v3325_v24 = vmul.f32 %v4166_v11, %v3319_v18  ;;  %v4971_v18 = vmov 0.0|0.0  }
0x1895   : > { %v3324_v25 = vmul.f32 %v4166_v11, %v3318_v19  ;;  %4840 = vmatprep.subr.bf16.mxu1 %v4971_v18 }
0x1896   : > { %v3331_v27 = vadd.f32 %v4167_v56, %v3325_v24 }
0x1897   : > { %v3330_v26 = vadd.f32 %v4167_v56, %v3324_v25 }
0x1899   : > { %4597 = vmatprep.mubr.msk.f32.mxu1 %vm723_vm0, %v3330_v26 }
0x189a   : > { %4598 = vmatmul.mubr.msk.f32.vlgmr.msra.gmra.mrb[24].mxu1 %vm723_vm0, %v3331_v27 }
0x189b   : > { %4623 = vmatprep.mubr.msk.f32.mxu1 %vm4972_vm14, %v4970_v53 }
0x196d   : > { %v4599_v42 = vpop.f32.mrb[24].mxu1 }
0x196e   : > { %v3420_v43 = vadd.f32 %v4599_v42, %v4172_v33  ;;  %v3414_v44 = vpop.f32.mrb[25].mxu1 }
0x196f   : > { %v3415_v45 = vadd.f32 %v4172_v33, %v3414_v44  ;;  %v3657_v33 = vld [vmem:[%s683_s27 + $0x8] sm:$0xff] }
0x1970   : > { %v3424_v12 = vmul.f32 %v3420_v43, %v3420_v43  ;;  %v4844_v44 = vpack.c.bf16 %v3657_v33, %v3656_v48 }
0x1971   : > { %v3423_v47 = vmul.f32 %v3415_v45, %v3415_v45 }
0x1972   : > { %v3426_v50 = vmul.f32 %v3424_v12, %v3420_v43  ;;  %v3659_v12 = vld [vmem:[%s683_s27 + $0x18] sm:$0xff] }
0x1973   : > { %v3425_v51 = vmul.f32 %v3423_v47, %v3415_v45 }
0x1974   : > { %v3428_v52 = vmul.f32 0.044715, %v3426_v50 }
0x1975   : > { %v3427_v57 = vmul.f32 0.044715, %v3425_v51  ;;  %v3741_v51 = vld [vmem:[%s691_s20] sm:$0xff] }
0x1976   : > { %v3430_v54 = vadd.f32 %v3428_v52, %v3420_v43  ;;  %v3742_v52 = vld [vmem:[%s691_s20 + $0x8] sm:$0xff] }
0x1977   : > { %v3429_v59 = vadd.f32 %v3427_v57, %v3415_v45  ;;  %v3743_v57 = vld [vmem:[%s691_s20 + $0x10] sm:$0xff] }
0x1978   : > { %v3432_v55 = vmul.f32 0.7978846, %v3430_v54  ;;  %v4850_v54 = vpack.c.bf16 %v3742_v52, %v3741_v51 }
0x1979   : > { %v3431_v60 = vmul.f32 0.7978846, %v3429_v59  ;;  %v3744_v59 = vld [vmem:[%s691_s20 + $0x18] sm:$0xff] }
0x197a   : > { %4950 = vtanh.f32 %v3432_v55  ;;  %v4853_v55 = vpack.c.bf16 %v3744_v59, %v3743_v57 }
0x197b   : > { %4952 = vtanh.f32 %v3431_v60 }
0x1984   : > { %v4951_v61 = vpop.eup %4950 }
0x1985   : > { %v4953_v58 = vpop.eup %4952  ;;  %v3436_v22 = vadd.f32 1.0, %v4951_v61 }
0x1986   : > { %v3435_v23 = vadd.f32 1.0, %v4953_v58 }
0x1987   : > { %v3438_v62 = vmul.f32 0.5, %v3436_v22 }
0x1988   : > { %v3437_v63 = vmul.f32 0.5, %v3435_v23  ;;  %v4191_v23 = vld [vmem:[%s694_s18] ss:$0 sm:$0xff] }
0x1989   : > { %v3440_v1 = vmul.f32 %v3438_v62, %v3420_v43  ;;  %v3582_v43 = vsel %vm3581_vm15, 1.0, %v4970_v53 }
0x198a   : > { %v3439_v0 = vmul.f32 %v3437_v63, %v3415_v45  ;;  %v3658_v45 = vld [vmem:[%s683_s27 + $0x10] sm:$0xff] }
0x198b   : > { %v4847_v47 = vpack.c.bf16 %v3659_v12, %v3658_v45 }
0x198c   : > { %4616 = vmatprep.mubr.msk.f32.mxu0 %vm2046_vm13, %v3439_v0 }
0x198d   : > { %4617 = vmatmul.mubr.msk.f32.vlgmr.msra.gmra.mrb[28].mxu0 %vm2046_vm13, %v3440_v1 }
0x1a60   : > { %v4618_v46 = vpop.f32.mrb[28].mxu0 }
0x1a61   : > { %v3533_v41 = vadd.f32 %v4618_v46, %v4183_v2  ;;  %v3527_v3 = vpop.f32.mrb[29].mxu0 }
0x1a62   : > { %v3528_v5 = vadd.f32 %v4183_v2, %v3527_v3 }
0x1a63   : > { %v3537_v13 = vadd.f32 %v3533_v41, %v3331_v27 }
0x1a64   : > { %v3536_v6 = vadd.f32 %v3528_v5, %v3330_v26 }
0x1a65   : > { %v3543_v4 = vsel %vm723_vm0, %v3537_v13, 0.0 }
0x1a66   : > { %3544 = vadd.xlane.f32.xlu1 %v3543_v4  ;;  %v3540_v21 = vsel %vm723_vm0, %v3536_v6, 0.0 }
0x1a67   : > { %3541 = vadd.xlane.f32.xlu0 %v3540_v21 }
0x1af3   : > { %v3545_v7 = vpop.xlane.xlu1 %3544 }
0x1af4   : > { %v3547_v8 = vmul.f32 0.03125, %v3545_v7  ;;  %v3542_v10 = vpop.xlane.xlu0 %3541 }
0x1af5   : > { %v3546_v15 = vmul.f32 0.03125, %v3542_v10 }
0x1af6   : > { %v3549_v16 = vsub.f32 %v3537_v13, %v3547_v8 }
0x1af7   : > { %v3548_v9 = vsub.f32 %v3536_v6, %v3546_v15 }
0x1af8   : > { %v3551_v20 = vmul.f32 %v3549_v16, %v3549_v16 }
0x1af9   : > { %v3550_v17 = vmul.f32 %v3548_v9, %v3548_v9 }
0x1afa   : > { %v3555_v11 = vsel %vm723_vm0, %v3551_v20, 0.0 }
0x1afb   : > { %3556 = vadd.xlane.f32.xlu1 %v3555_v11  ;;  %v3552_v35 = vsel %vm723_vm0, %v3550_v17, 0.0 }
0x1afc   : > { %3553 = vadd.xlane.f32.xlu0 %v3552_v35 }
0x1b88   : > { %v3557_v19 = vpop.xlane.xlu1 %3556 }
0x1b89   : > { %v3559_v56 = vmul.f32 0.03125, %v3557_v19  ;;  %v3554_v24 = vpop.xlane.xlu0 %3553 }
0x1b8a   : > { %v3558_v25 = vmul.f32 0.03125, %v3554_v24 }
0x1b8b   : > { %v3561_v26 = vadd.f32 1e-12, %v3559_v56 }
0x1b8c   : > { %v3560_v27 = vadd.f32 1e-12, %v3558_v25 }
0x1b8d   : > { %4954 = vrsqrt.f32 %v3561_v26 }
0x1b8e   : > { %4956 = vrsqrt.f32 %v3560_v27 }
0x1b97   : > { %v4955_v14 = vpop.eup %4954 }
0x1b98   : > { %v4957_v30 = vpop.eup %4956  ;;  %v3565_v31 = vmul.f32 %v4955_v14, %v3549_v16 }
0x1b99   : > { %v3564_v32 = vmul.f32 %v4957_v30, %v3548_v9 }
0x1b9a   : > { %v3571_v36 = vmul.f32 %v4186_v29, %v3565_v31 }
0x1b9b   : > { %v3570_v38 = vmul.f32 %v4186_v29, %v3564_v32 }
0x1b9c   : > { %v3577_v39 = vadd.f32 %v4187_v34, %v3571_v36 }
0x1b9d   : > { %v3576_v40 = vadd.f32 %v4187_v34, %v3570_v38 }
0x1b9f   : > { %v4841_v42 = vpack.c.bf16 %v3577_v39, %v3576_v40 }
0x1ba1   : > { %4842 = vmatpush3.bf16.msra.mxu1 %v4841_v42 }
0x1ba2   : > { %4843 = vmatprep.subr.bf16.mxu1 %v4971_v18 }
0x1ba4   : > { %4624 = vmatmul.mubr.msk.f32.vlgmr.msra.gmra.mrb[26].mxu1 %vm1120_vm12, %v3582_v43 }
0x1ba5   : > { %4845 = vmatpush3.bf16.msra.mxu1 %v4844_v44  ;;  %4634 = vmatprep.mubr.msk.f32.mxu1 %vm4972_vm14, %v4970_v53 }
0x1ba6   : > { %4846 = vmatprep.subr.bf16.mxu1 %v4971_v18 }
0x1ba9   : > { %4848 = vmatpush3.bf16.msra.mxu1 %v4847_v47 }
0x1baa   : > { %4849 = vmatprep.subr.bf16.mxu1 %v4971_v18 }
0x1c77   : > { %v3652_v49 = vpop.f32.mrb[26].mxu1 }
0x1c78   : > { %v4625_v50 = vpop.f32.mrb[27].mxu1  ;;  %4635 = vmatmul.mubr.msk.f32.vlgmr.msra.gmra.mrb[28].mxu1 %vm723_vm0, %v3652_v49 }
0x1c79   : > { %4645 = vmatprep.mubr.msk.f32.mxu1 %vm4972_vm14, %v4970_v53  ;;  %4851 = vmatpush3.bf16.msra.mxu1 %v4850_v54  ;;  %v4189_v53 = vld [vmem:[%s686_s25] ss:$0 sm:$0xff] }
0x1c7a   : > { %4852 = vmatprep.subr.bf16.mxu1 %v4971_v18 }
0x1c7d   : > { %4854 = vmatpush3.bf16.msra.mxu1 %v4853_v55 }
0x1d4b   : > { %v3736_v60 = vpop.f32.mrb[28].mxu1 }
0x1d4c   : > { %v3737_v61 = vadd.f32 %v4189_v53, %v3736_v60  ;;  %v4636_v58 = vpop.f32.mrb[29].mxu1 }
0x1d4e   : > { %4958 = vtanh.f32 %v3737_v61 }
0x1d58   : > { %v4959_v22 = vpop.eup %4958 }
0x1d59   : > { %4646 = vmatmul.mubr.msk.f32.vlgmr.msra.gmra.mrb[30].mxu1 %vm723_vm0, %v4959_v22 }
0x1e2c   : > { %v3821_v62 = vpop.f32.mrb[30].mxu1 }
0x1e2d   : > { %v3822_v63 = vadd.f32 %v4191_v23, %v3821_v62  ;;  %v4647_v0 = vpop.f32.mrb[31].mxu1 }
0x1e2f   : > { %3825 = vst [vmem:[%s698_s23] sm:$0x3] %v3822_v63 }
0x1e30 PF: > { %s24_s29 = sadd.s32 1, %s4968_s29  }
0x1e31   : > { %p21_p4 = scmp.ge.s32.totalorder %s24_s29, 4  }
0x1e33   :  { %23 = sbr.rel (!%p21_p4) target bundleno = 1 (0x1), region = 154 }

</bundles_post_ra>
